<compile_context>
chip_gen: v5e
topology: v5e:2x2
jax: 0.10.0
libtpu: 0.0.40
codegen_flags: <defaults>
</compile_context>

<pallas_src>
import functools

import jax
import jax.numpy as jnp
import numpy as np
from jax.experimental import pallas as pl
from jax.experimental.pallas import tpu as pltpu


# ---------------------------------------------------------------------------
# Stage 1: support = X @ W  (computed once; output emitted in compute dtype).
# ---------------------------------------------------------------------------
def support_kernel(x_ref, w_ref, out_ref):
    out_ref[...] = jnp.dot(
        x_ref[...], w_ref[...], preferred_element_type=jnp.float32
    ).astype(out_ref.dtype)


# ---------------------------------------------------------------------------
# Stage 2: out = adj @ support + bias, k-tiled with an f32 accumulator.
# ---------------------------------------------------------------------------
def aggregate_kernel(adj_ref, sup_ref, b_ref, out_ref, acc_ref):
    k = pl.program_id(1)

    @pl.when(k == 0)
    def _init():
        acc_ref[...] = jnp.zeros_like(acc_ref)

    acc_ref[...] += jnp.dot(
        adj_ref[...], sup_ref[...], preferred_element_type=jnp.float32
    )

    @pl.when(k == pl.num_programs(1) - 1)
    def _finalize():
        # Bias add rides in the VPU slot of the finalize step only.
        out_ref[...] = (acc_ref[...] + b_ref[...]).astype(out_ref.dtype)


@functools.partial(jax.jit, static_argnames=("tm", "tk", "compute_dtype"))
def graph_convolution(x, adj, weight, bias, *, tm=256, tk=256,
                      compute_dtype=jnp.bfloat16):
    """GCN layer forward.  tm=256/tk=256 for v6e/v7x; use tm=128 on v5e."""
    N, f_in = x.shape
    f_out = weight.shape[1]
    assert adj.shape == (N, N)

    tm = min(tm, N)
    tk = min(tk, N)
    assert N % tm == 0 and N % tk == 0

    c_bytes = jnp.dtype(compute_dtype).itemsize

    # ---- Stage 1: support = X @ W (once) ----------------------------------
    support = pl.pallas_call(
        support_kernel,
        out_shape=jax.ShapeDtypeStruct((N, f_out), compute_dtype),
        grid_spec=pltpu.PrefetchScalarGridSpec(
            num_scalar_prefetch=0,
            grid=(N // tm,),
            in_specs=[
                pl.BlockSpec((tm, f_in), lambda i: (i, 0)),      # row tile of X
                pl.BlockSpec((f_in, f_out), lambda i: (0, 0)),   # full W
            ],
            out_specs=pl.BlockSpec((tm, f_out), lambda i: (i, 0)),
        ),
        compiler_params=pltpu.CompilerParams(
            dimension_semantics=("parallel",)),
        cost_estimate=pl.CostEstimate(
            flops=2 * N * f_in * f_out,
            transcendentals=0,
            bytes_accessed=(N * f_in * x.dtype.itemsize
                            + f_in * f_out * weight.dtype.itemsize
                            + N * f_out * c_bytes)),
    )(x, weight)

    # Adjacency streamed in the (narrow) compute dtype; callers should prepare
    # it in bf16 once up front so the per-call HBM traffic is halved.
    adj_c = adj if adj.dtype == compute_dtype else adj.astype(compute_dtype)
    bias2d = bias.reshape(1, f_out).astype(jnp.float32)

    # ---- Stage 2: out = adj @ support + bias -------------------------------
    out = pl.pallas_call(
        aggregate_kernel,
        out_shape=jax.ShapeDtypeStruct((N, f_out), jnp.float32),
        grid_spec=pltpu.PrefetchScalarGridSpec(
            num_scalar_prefetch=0,
            grid=(N // tm, N // tk),
            in_specs=[
                pl.BlockSpec((tm, tk), lambda i, k: (i, k)),       # adj tile
                pl.BlockSpec((tk, f_out), lambda i, k: (k, 0)),    # support tile
                pl.BlockSpec((1, f_out), lambda i, k: (0, 0)),     # bias (const)
            ],
            out_specs=pl.BlockSpec((tm, f_out), lambda i, k: (i, 0)),
            scratch_shapes=[pltpu.VMEM((tm, f_out), jnp.float32)],
        ),
        compiler_params=pltpu.CompilerParams(
            dimension_semantics=("parallel", "arbitrary")),
        cost_estimate=pl.CostEstimate(
            flops=2 * N * N * f_out,
            transcendentals=0,
            bytes_accessed=(N * N * c_bytes           # adj stream (dominant)
                            + N * f_out * c_bytes     # support
                            + N * f_out * 4           # output
                            + f_out * 4)),            # bias
    )(adj_c, support, bias2d)

    return out


if __name__ == "__main__":
    # Small, module-consistent shapes (big enough to exercise tm=256, tk=256
    # tiling and the k-reduction accumulator: grid = (2, 2)).
    N = 512        # number of graph nodes
    F_IN = 64      # in_features
    F_OUT = 128    # out_features

    key = jax.random.PRNGKey(0)
    k_x, k_adj, k_w, k_b = jax.random.split(key, 4)

    # Inputs.
    x = jax.random.normal(k_x, (N, F_IN), dtype=jnp.float32)
    # Dense row-normalized adjacency stand-in for the sparse adj.
    adj_raw = (jax.random.uniform(k_adj, (N, N)) > 0.9).astype(jnp.float32)
    adj = adj_raw + jnp.eye(N, dtype=jnp.float32)
    adj = adj / jnp.sum(adj, axis=1, keepdims=True)

    # Deterministic parameter init, matching reset_parameters():
    # uniform(-stdv, stdv) with stdv = 1/sqrt(out_features).
    stdv = 1.0 / np.sqrt(F_OUT)
    weight = jax.random.uniform(
        k_w, (F_IN, F_OUT), minval=-stdv, maxval=stdv, dtype=jnp.float32
    )
    bias = jax.random.uniform(
        k_b, (F_OUT,), minval=-stdv, maxval=stdv, dtype=jnp.float32
    )

    # Prepare the bf16 adjacency once up front (real pipelines would store it
    # this way so every layer call streams half the HBM bytes).
    adj_bf16 = adj.astype(jnp.bfloat16)

    out = graph_convolution(x, adj_bf16, weight, bias)
    out = jax.block_until_ready(out)

    # Check 1 (tight-ish): reference using the same bf16 operands with f32
    # accumulation, i.e. the kernel's own numerics.
    support_bf16 = (x @ weight).astype(jnp.bfloat16)
    ref_bf16 = jnp.dot(
        adj_bf16.astype(jnp.float32), support_bf16.astype(jnp.float32)
    ) + bias
    np.testing.assert_allclose(
        np.asarray(out), np.asarray(ref_bf16), rtol=5e-3, atol=5e-3
    )

    # Check 2 (semantic): full-f32 module reference; bf16 adj/support rounding
    # keeps us well within a loose tolerance.
    ref_f32 = adj @ (x @ weight) + bias
    np.testing.assert_allclose(
        np.asarray(out), np.asarray(ref_f32), rtol=2e-2, atol=2e-2
    )

    print("KERNEL_OK")
</pallas_src>

<mosaic_0001>
module attributes {stable_mosaic.version = 11 : i64} {
  func.func @support_kernel(%arg0: i32, %arg1: memref<256x64xf32, #tpu.memory_space<vmem>>, %arg2: memref<64x128xf32, #tpu.memory_space<vmem>>, %arg3: memref<256x128xbf16, #tpu.memory_space<vmem>>) attributes {dimension_semantics = [#tpu.dimension_semantics<parallel>], iteration_bounds = array<i64: 2>, scalar_prefetch = 0 : i64, scratch_operands = 0 : i64, tpu.core_type = #tpu.core_type<tc>, window_params = [{transform_indices = @transform_0, window_bounds = array<i64: 256, 64>}, {pipeline_mode = #tpu.pipeline_mode<synchronous>, transform_indices = @transform_1, window_bounds = array<i64: 64, 128>}, {transform_indices = @transform_2, window_bounds = array<i64: 256, 128>}]} {
    %c0 = arith.constant 0 : index
    %c0_0 = arith.constant 0 : index
    %0 = vector.load %arg1[%c0, %c0_0] : memref<256x64xf32, #tpu.memory_space<vmem>>, vector<256x64xf32>
    %c0_1 = arith.constant 0 : index
    %c0_2 = arith.constant 0 : index
    %1 = vector.load %arg2[%c0_1, %c0_2] : memref<64x128xf32, #tpu.memory_space<vmem>>, vector<64x128xf32>
    %cst = arith.constant dense<0.000000e+00> : vector<256x128xf32>
    %2 = tpu.matmul %0, %1, %cst {dimension_numbers = #tpu.dot_dimension_numbers<[1], [0], [0], [1], [0, 0, 1, 1], [], []>} : vector<256x64xf32>, vector<64x128xf32>, vector<256x128xf32> -> vector<256x128xf32>
    %3 = arith.truncf %2 : vector<256x128xf32> to vector<256x128xbf16>
    %c0_3 = arith.constant 0 : index
    %c0_4 = arith.constant 0 : index
    %4 = vector.load %arg3[%c0_3, %c0_4] : memref<256x128xbf16, #tpu.memory_space<vmem>>, vector<256x128xbf16>
    tpu.vector_store %arg3[%c0_3, %c0_4], %3 {strides = array<i32>} : memref<256x128xbf16, #tpu.memory_space<vmem>>, vector<256x128xbf16>,
    return
  }
  func.func @transform_0(%arg0: i32) -> (i32, i32) {
    %c0_i32 = arith.constant 0 : i32
    %c0_i32_0 = arith.constant 0 : i32
    return %arg0, %c0_i32 : i32, i32
  }
  func.func @transform_1(%arg0: i32) -> (i32, i32) {
    %c0_i32 = arith.constant 0 : i32
    %c0_i32_0 = arith.constant 0 : i32
    %c0_i32_1 = arith.constant 0 : i32
    return %c0_i32, %c0_i32_0 : i32, i32
  }
  func.func @transform_2(%arg0: i32) -> (i32, i32) {
    %c0_i32 = arith.constant 0 : i32
    %c0_i32_0 = arith.constant 0 : i32
    return %arg0, %c0_i32 : i32, i32
  }
}

module attributes {stable_mosaic.version = 11 : i64} {
  func.func @aggregate_kernel(%arg0: i32, %arg1: i32, %arg2: memref<256x256xbf16, #tpu.memory_space<vmem>>, %arg3: memref<256x128xbf16, #tpu.memory_space<vmem>>, %arg4: memref<1x128xf32, #tpu.memory_space<vmem>>, %arg5: memref<256x128xf32, #tpu.memory_space<vmem>>, %arg6: memref<256x128xf32, #tpu.memory_space<vmem>>) attributes {dimension_semantics = [#tpu.dimension_semantics<parallel>, #tpu.dimension_semantics<arbitrary>], iteration_bounds = array<i64: 2, 2>, scalar_prefetch = 0 : i64, scratch_operands = 1 : i64, tpu.core_type = #tpu.core_type<tc>, window_params = [{transform_indices = @transform_0, window_bounds = array<i64: 256, 256>}, {transform_indices = @transform_1, window_bounds = array<i64: 256, 128>}, {pipeline_mode = #tpu.pipeline_mode<synchronous>, transform_indices = @transform_2, window_bounds = array<i64: 1, 128>}, {transform_indices = @transform_3, window_bounds = array<i64: 256, 128>}]} {
    %c0_i32 = arith.constant 0 : i32
    %0 = arith.cmpi eq, %arg1, %c0_i32 : i32
    %1 = arith.extui %0 : i1 to i32
    %c0_i32_0 = arith.constant 0 : i32
    %2 = arith.cmpi ne, %1, %c0_i32_0 : i32
    scf.if %2 {
      %cst_9 = arith.constant 0.000000e+00 : f32
      %12 = vector.broadcast %cst_9 : f32 to vector<256x128xf32>
      %c0_10 = arith.constant 0 : index
      %c0_11 = arith.constant 0 : index
      %13 = vector.load %arg6[%c0_10, %c0_11] : memref<256x128xf32, #tpu.memory_space<vmem>>, vector<256x128xf32>
      tpu.vector_store %arg6[%c0_10, %c0_11], %12 {strides = array<i32>} : memref<256x128xf32, #tpu.memory_space<vmem>>, vector<256x128xf32>,
    } else {
    }
    %c0 = arith.constant 0 : index
    %c0_1 = arith.constant 0 : index
    %3 = vector.load %arg6[%c0, %c0_1] : memref<256x128xf32, #tpu.memory_space<vmem>>, vector<256x128xf32>
    %c0_2 = arith.constant 0 : index
    %c0_3 = arith.constant 0 : index
    %4 = vector.load %arg2[%c0_2, %c0_3] : memref<256x256xbf16, #tpu.memory_space<vmem>>, vector<256x256xbf16>
    %c0_4 = arith.constant 0 : index
    %c0_5 = arith.constant 0 : index
    %5 = vector.load %arg3[%c0_4, %c0_5] : memref<256x128xbf16, #tpu.memory_space<vmem>>, vector<256x128xbf16>
    %cst = arith.constant dense<0.000000e+00> : vector<256x128xf32>
    %6 = tpu.matmul %4, %5, %cst {dimension_numbers = #tpu.dot_dimension_numbers<[1], [0], [0], [1], [0, 0, 1, 1], [], []>} : vector<256x256xbf16>, vector<256x128xbf16>, vector<256x128xf32> -> vector<256x128xf32>
    %7 = arith.addf %3, %6 : vector<256x128xf32>
    %c0_6 = arith.constant 0 : index
    %c0_7 = arith.constant 0 : index
    %8 = vector.load %arg6[%c0_6, %c0_7] : memref<256x128xf32, #tpu.memory_space<vmem>>, vector<256x128xf32>
    tpu.vector_store %arg6[%c0_6, %c0_7], %7 {strides = array<i32>} : memref<256x128xf32, #tpu.memory_space<vmem>>, vector<256x128xf32>,
    %c1_i32 = arith.constant 1 : i32
    %9 = arith.cmpi eq, %arg1, %c1_i32 : i32
    %10 = arith.extui %9 : i1 to i32
    %c0_i32_8 = arith.constant 0 : i32
    %11 = arith.cmpi ne, %10, %c0_i32_8 : i32
    scf.if %11 {
      %c0_9 = arith.constant 0 : index
      %c0_10 = arith.constant 0 : index
      %12 = vector.load %arg6[%c0_9, %c0_10] : memref<256x128xf32, #tpu.memory_space<vmem>>, vector<256x128xf32>
      %c0_11 = arith.constant 0 : index
      %c0_12 = arith.constant 0 : index
      %13 = vector.load %arg4[%c0_11, %c0_12] : memref<1x128xf32, #tpu.memory_space<vmem>>, vector<1x128xf32>
      %14 = vector.broadcast %13 : vector<1x128xf32> to vector<256x128xf32>
      %15 = arith.addf %12, %14 : vector<256x128xf32>
      %c0_13 = arith.constant 0 : index
      %c0_14 = arith.constant 0 : index
      %16 = vector.load %arg5[%c0_13, %c0_14] : memref<256x128xf32, #tpu.memory_space<vmem>>, vector<256x128xf32>
      tpu.vector_store %arg5[%c0_13, %c0_14], %15 {strides = array<i32>} : memref<256x128xf32, #tpu.memory_space<vmem>>, vector<256x128xf32>,
    } else {
    }
    return
  }
  func.func @transform_0(%arg0: i32, %arg1: i32) -> (i32, i32) {
    %c0_i32 = arith.constant 0 : i32
    return %arg0, %arg1 : i32, i32
  }
  func.func @transform_1(%arg0: i32, %arg1: i32) -> (i32, i32) {
    %c0_i32 = arith.constant 0 : i32
    %c0_i32_0 = arith.constant 0 : i32
    return %arg1, %c0_i32 : i32, i32
  }
  func.func @transform_2(%arg0: i32, %arg1: i32) -> (i32, i32) {
    %c0_i32 = arith.constant 0 : i32
    %c0_i32_0 = arith.constant 0 : i32
    %c0_i32_1 = arith.constant 0 : i32
    return %c0_i32, %c0_i32_0 : i32, i32
  }
  func.func @transform_3(%arg0: i32, %arg1: i32) -> (i32, i32) {
    %c0_i32 = arith.constant 0 : i32
    %c0_i32_0 = arith.constant 0 : i32
    return %arg0, %c0_i32 : i32, i32
  }
}

</mosaic_0001>

<bundles_post_ra>
// kernel: graph_convolution.2
= control target key start
LH: loop header
LB: loop body
LE: loop exit
PB: predicated region body
PF: predicated region fallthrough
CT: control target
= control target key end

     0   :  { %7 = vsyncpa [#allocation3], 0  ;;  %s791_s9 = smov 0   ;;  %s899_s0 = inlined_call_operand.vmem [shape: f32[512,64], index: 0, kind: input, shape index: {}]   ;;  %s900_s1 = inlined_call_operand.hbm [shape: f32[64,128], index: 1, kind: input, shape index: {}]   ;;  %s901_s2 = inlined_call_operand.vmem [shape: bf16[512,128], index: 2, kind: output, shape index: {}]  }
   0x1 LB: > { %s102_s12 = sshll.u32 %s900_s1, 4  ;;  %s546_s13 = sadd.s32 4294967295, %s771_s9   ;;  %s771_s9 = sphi %s791_s9, %s13_s9   ;;  %s103_s12 = int_to_ptr.hbm [resolvable:$true] %s102_s12 }
   0x2   : > { %p548_p0 = scmp.ge.s32.totalorder %s771_s9, 1  ;;  %p91_p1 = scmp.lt.s32.totalorder %s771_s9, 3 }
   0x3   : > { %p718_p2 = scmp.eq.s32.totalorder %s546_s13, 0  ;;  %s773_s14 = smov [#allocation2]  }
   0x4   : > { %p92_p3 = pnand %p548_p0, %p91_p1  ;;  %s104_s15 = sshll.u32 %s773_s14, 4  ;;  %s105_s15 = int_to_ptr.vmem [resolvable:$true] %s104_s15 }
   0x5   : > { %s774_s16 = smov 128   ;;  %s775_s17 = smov 8  }
   0x6   : > { %p714_p4 = pneg %p92_p3  ;;  %129 = sbr.rel (%p92_p3) target bundleno = 222 (0xde), region = 28 }
   0x8   : > { %p715_p5 = pnand %p718_p2, %p714_p4 }
   0xa   : > { %717 = dma.hbm_to_vmem [thread:$0]  (!%p715_p5), %s103_s12, 1024, %s105_s15, [#allocation3], %s774_s16, %s774_s16, %s775_s17  }
   0xb   : > { %766 = dma.done.wait (%p718_p2), [#allocation3], 1024  }
   0xc   : > { %768 = vsyncadd (%p718_p2), [#allocation3], 4294966272  ;;  %s553_s18 = sshll.u32 %s546_s13, 5  ;;  %v203_v0 = vld [vmem:[#allocation2 + $0x38] sm:$0xff]  ;;  %v202_v1 = vld [vmem:[#allocation2 + $0x30] sm:$0xff]  ;;  %vm204_vm0 = vcmask 523264  }
   0xd   : > { %p153_p6 = scmp.lt.s32.totalorder %s553_s18, 63  ;;  %309 = vmatpush.msra.mxu0 %v203_v0  ;;  %686 = vmatpush.msra.mxu1 %v203_v0  ;;  %v201_v2 = vld [vmem:[#allocation2 + $0x28] sm:$0xff]  ;;  %v200_v3 = vld [vmem:[#allocation2 + $0x20] sm:$0xff]  ;;  %v199_v4 = vld [vmem:[#allocation2 + $0x18] sm:$0xff] }
   0xe   : > { %687 = vmatpush.msra.mxu2 %v203_v0  ;;  %688 = vmatpush.msra.mxu3 %v203_v0  ;;  %v198_v5 = vld [vmem:[#allocation2 + $0x10] sm:$0xff]  ;;  %v197_v6 = vld [vmem:[#allocation2 + $0x8] sm:$0xff]  ;;  %v196_v7 = vld [vmem:[#allocation2] sm:$0xff] }
   0xf   : > { %310 = vmatpush.msra.mxu0 %v202_v1  ;;  %689 = vmatpush.msra.mxu1 %v202_v1  ;;  %s903_s18 = smov (!%p153_p6, %s553_s18), 63 }
  0x10   : > { %690 = vmatpush.msra.mxu2 %v202_v1  ;;  %691 = vmatpush.msra.mxu3 %v202_v1  ;;  %s554_s19 = sshll.u32 %s903_s18, 3  ;;  %s556_s23 = sshll.u32 %s903_s18, 2 }
  0x11   : > { %311 = vmatpush.msra.mxu0 %v201_v2  ;;  %692 = vmatpush.msra.mxu1 %v201_v2  ;;  %s808_s22 = scalar_lea.vmem %s899_s0, %s554_s19  ;;  %s878_s26 = scalar_lea.vmem %s901_s2, %s556_s23 }
  0x12   : > { %693 = vmatpush.msra.mxu2 %v201_v2  ;;  %694 = vmatpush.msra.mxu3 %v201_v2  ;;  %v164_v8 = vld [vmem:[%s808_s22] sm:$0xff]  ;;  %v165_v12 = vld [vmem:[%s808_s22 + $0x8] sm:$0xff]  ;;  %v166_v16 = vld [vmem:[%s808_s22 + $0x10] sm:$0xff] }
  0x13   : > { %312 = vmatpush.msra.mxu0 %v200_v3  ;;  %695 = vmatpush.msra.mxu1 %v200_v3  ;;  %v172_v9 = vld [vmem:[%s808_s22 + $0x40] sm:$0xff]  ;;  %v173_v13 = vld [vmem:[%s808_s22 + $0x48] sm:$0xff]  ;;  %v174_v17 = vld [vmem:[%s808_s22 + $0x50] sm:$0xff] }
  0x14   : > { %696 = vmatpush.msra.mxu2 %v200_v3  ;;  %697 = vmatpush.msra.mxu3 %v200_v3  ;;  %v180_v10 = vld [vmem:[%s808_s22 + $0x80] sm:$0xff]  ;;  %v181_v14 = vld [vmem:[%s808_s22 + $0x88] sm:$0xff]  ;;  %v182_v18 = vld [vmem:[%s808_s22 + $0x90] sm:$0xff] }
  0x15   : > { %313 = vmatpush.msra.mxu0 %v199_v4  ;;  %698 = vmatpush.msra.mxu1 %v199_v4  ;;  %v188_v11 = vld [vmem:[%s808_s22 + $0xc0] sm:$0xff]  ;;  %v189_v15 = vld [vmem:[%s808_s22 + $0xc8] sm:$0xff]  ;;  %v190_v19 = vld [vmem:[%s808_s22 + $0xd0] sm:$0xff] }
  0x16   : > { %699 = vmatpush.msra.mxu2 %v199_v4  ;;  %700 = vmatpush.msra.mxu3 %v199_v4  ;;  %v167_v20 = vld [vmem:[%s808_s22 + $0x18] sm:$0xff]  ;;  %v168_v24 = vld [vmem:[%s808_s22 + $0x20] sm:$0xff]  ;;  %v169_v28 = vld [vmem:[%s808_s22 + $0x28] sm:$0xff] }
  0x17   : > { %314 = vmatpush.msra.mxu0 %v198_v5  ;;  %701 = vmatpush.msra.mxu1 %v198_v5  ;;  %v175_v21 = vld [vmem:[%s808_s22 + $0x58] sm:$0xff]  ;;  %v176_v25 = vld [vmem:[%s808_s22 + $0x60] sm:$0xff]  ;;  %v177_v29 = vld [vmem:[%s808_s22 + $0x68] sm:$0xff] }
  0x18   : > { %702 = vmatpush.msra.mxu2 %v198_v5  ;;  %703 = vmatpush.msra.mxu3 %v198_v5  ;;  %v183_v22 = vld [vmem:[%s808_s22 + $0x98] sm:$0xff]  ;;  %v184_v26 = vld [vmem:[%s808_s22 + $0xa0] sm:$0xff]  ;;  %v185_v30 = vld [vmem:[%s808_s22 + $0xa8] sm:$0xff] }
  0x19   : > { %315 = vmatpush.msra.mxu0 %v197_v6  ;;  %704 = vmatpush.msra.mxu1 %v197_v6  ;;  %v191_v23 = vld [vmem:[%s808_s22 + $0xd8] sm:$0xff]  ;;  %v192_v27 = vld [vmem:[%s808_s22 + $0xe0] sm:$0xff]  ;;  %v193_v31 = vld [vmem:[%s808_s22 + $0xe8] sm:$0xff] }
  0x1a   : > { %705 = vmatpush.msra.mxu2 %v197_v6  ;;  %706 = vmatpush.msra.mxu3 %v197_v6  ;;  %v170_v32 = vld [vmem:[%s808_s22 + $0x30] sm:$0xff]  ;;  %v171_v36 = vld [vmem:[%s808_s22 + $0x38] sm:$0xff] }
  0x1b   : > { %316 = vmatpush.msra.mxu0 %v196_v7  ;;  %707 = vmatpush.msra.mxu1 %v196_v7  ;;  %v178_v33 = vld [vmem:[%s808_s22 + $0x70] sm:$0xff]  ;;  %v179_v37 = vld [vmem:[%s808_s22 + $0x78] sm:$0xff] }
  0x1c   : > { %708 = vmatpush.msra.mxu2 %v196_v7  ;;  %709 = vmatpush.msra.mxu3 %v196_v7  ;;  %v186_v34 = vld [vmem:[%s808_s22 + $0xb0] sm:$0xff]  ;;  %v187_v38 = vld [vmem:[%s808_s22 + $0xb8] sm:$0xff] }
  0x1d   : > { %557 = vmatmul.msk.f32.vlgmr.msra.gmra.mxu0 %vm204_vm0, %v164_v8  ;;  %565 = vmatmul.msk.f32.vlgmr.msra.gmra.mxu1 %vm204_vm0, %v172_v9  ;;  %v194_v35 = vld [vmem:[%s808_s22 + $0xf0] sm:$0xff]  ;;  %v195_v39 = vld [vmem:[%s808_s22 + $0xf8] sm:$0xff] }
  0x1e   : > { %573 = vmatmul.msk.f32.vlgmr.msra.gmra.mxu2 %vm204_vm0, %v180_v10  ;;  %581 = vmatmul.msk.f32.vlgmr.msra.gmra.mxu3 %vm204_vm0, %v188_v11 }
  0x25   : > { %558 = vmatmul.msk.f32.gmra.mxu0 %vm204_vm0, %v165_v12  ;;  %566 = vmatmul.msk.f32.gmra.mxu1 %vm204_vm0, %v173_v13 }
  0x26   : > { %574 = vmatmul.msk.f32.gmra.mxu2 %vm204_vm0, %v181_v14  ;;  %582 = vmatmul.msk.f32.gmra.mxu3 %vm204_vm0, %v189_v15 }
  0x2d   : > { %559 = vmatmul.msk.f32.gmra.mxu0 %vm204_vm0, %v166_v16  ;;  %567 = vmatmul.msk.f32.gmra.mxu1 %vm204_vm0, %v174_v17 }
  0x2e   : > { %575 = vmatmul.msk.f32.gmra.mxu2 %vm204_vm0, %v182_v18  ;;  %583 = vmatmul.msk.f32.gmra.mxu3 %vm204_vm0, %v190_v19 }
  0x35   : > { %560 = vmatmul.msk.f32.gmra.mxu0 %vm204_vm0, %v167_v20  ;;  %568 = vmatmul.msk.f32.gmra.mxu1 %vm204_vm0, %v175_v21 }
  0x36   : > { %576 = vmatmul.msk.f32.gmra.mxu2 %vm204_vm0, %v183_v22  ;;  %584 = vmatmul.msk.f32.gmra.mxu3 %vm204_vm0, %v191_v23 }
  0x3d   : > { %561 = vmatmul.msk.f32.gmra.mxu0 %vm204_vm0, %v168_v24  ;;  %569 = vmatmul.msk.f32.gmra.mxu1 %vm204_vm0, %v176_v25 }
  0x3e   : > { %577 = vmatmul.msk.f32.gmra.mxu2 %vm204_vm0, %v184_v26  ;;  %585 = vmatmul.msk.f32.gmra.mxu3 %vm204_vm0, %v192_v27 }
  0x45   : > { %562 = vmatmul.msk.f32.gmra.mxu0 %vm204_vm0, %v169_v28  ;;  %570 = vmatmul.msk.f32.gmra.mxu1 %vm204_vm0, %v177_v29 }
  0x46   : > { %578 = vmatmul.msk.f32.gmra.mxu2 %vm204_vm0, %v185_v30  ;;  %586 = vmatmul.msk.f32.gmra.mxu3 %vm204_vm0, %v193_v31 }
  0x4d   : > { %563 = vmatmul.msk.f32.gmra.mxu0 %vm204_vm0, %v170_v32  ;;  %571 = vmatmul.msk.f32.gmra.mxu1 %vm204_vm0, %v178_v33 }
  0x4e   : > { %579 = vmatmul.msk.f32.gmra.mxu2 %vm204_vm0, %v186_v34  ;;  %587 = vmatmul.msk.f32.gmra.mxu3 %vm204_vm0, %v194_v35 }
  0x55   : > { %564 = vmatmul.msk.f32.gmra.mxu0 %vm204_vm0, %v171_v36  ;;  %572 = vmatmul.msk.f32.gmra.mxu1 %vm204_vm0, %v179_v37 }
  0x56   : > { %580 = vmatmul.msk.f32.gmra.mxu2 %vm204_vm0, %v187_v38  ;;  %588 = vmatmul.msk.f32.gmra.mxu3 %vm204_vm0, %v195_v39 }
  0x9a   : > { %v318_v40 = vpop.f32.mrf.mxu0  ;;  %v342_v41 = vpop.f32.mrf.mxu1 }
  0xa1   : > { %v366_v42 = vpop.f32.mrf.mxu2  ;;  %v390_v43 = vpop.f32.mrf.mxu3 }
  0xa2   : > { %v321_v44 = vpop.f32.mrf.mxu0  ;;  %v345_v45 = vpop.f32.mrf.mxu1 }
  0xa3   : > { %v594_v46 = vpack.c.bf16 %v321_v44, %v318_v40  ;;  %v614_v47 = vpack.c.bf16 %v345_v45, %v342_v41 }
  0xa5   : > { %595 = vst [vmem:[%s878_s26] sm:$0xff] %v594_v46  }
  0xa6   : > { %674 = vst [vmem:[%s878_s26 + $0x20] sm:$0xff] %v614_v47  }
  0xa9   : > { %v369_v48 = vpop.f32.mrf.mxu2  ;;  %v393_v49 = vpop.f32.mrf.mxu3 }
  0xaa   : > { %v634_v50 = vpack.c.bf16 %v369_v48, %v366_v42  ;;  %v654_v51 = vpack.c.bf16 %v393_v49, %v390_v43  ;;  %v324_v52 = vpop.f32.mrf.mxu0  ;;  %v348_v53 = vpop.f32.mrf.mxu1 }
  0xac   : > { %678 = vst [vmem:[%s878_s26 + $0x40] sm:$0xff] %v634_v50  }
  0xad   : > { %682 = vst [vmem:[%s878_s26 + $0x60] sm:$0xff] %v654_v51  }
  0xb1   : > { %v372_v54 = vpop.f32.mrf.mxu2  ;;  %v396_v55 = vpop.f32.mrf.mxu3 }
  0xb2   : > { %v327_v56 = vpop.f32.mrf.mxu0  ;;  %v351_v57 = vpop.f32.mrf.mxu1 }
  0xb3   : > { %v599_v58 = vpack.c.bf16 %v327_v56, %v324_v52  ;;  %v619_v59 = vpack.c.bf16 %v351_v57, %v348_v53 }
  0xb5   : > { %671 = vst [vmem:[%s878_s26 + $0x8] sm:$0xff] %v599_v58  }
  0xb6   : > { %675 = vst [vmem:[%s878_s26 + $0x28] sm:$0xff] %v619_v59  }
  0xb9   : > { %v375_v60 = vpop.f32.mrf.mxu2  ;;  %v399_v61 = vpop.f32.mrf.mxu3 }
  0xba   : > { %v639_v62 = vpack.c.bf16 %v375_v60, %v372_v54  ;;  %v659_v63 = vpack.c.bf16 %v399_v61, %v396_v55  ;;  %v330_v0 = vpop.f32.mrf.mxu0  ;;  %v354_v1 = vpop.f32.mrf.mxu1 }
  0xbc   : > { %679 = vst [vmem:[%s878_s26 + $0x48] sm:$0xff] %v639_v62  }
  0xbd   : > { %683 = vst [vmem:[%s878_s26 + $0x68] sm:$0xff] %v659_v63  }
  0xc1   : > { %v378_v2 = vpop.f32.mrf.mxu2  ;;  %v402_v3 = vpop.f32.mrf.mxu3 }
  0xc2   : > { %v333_v4 = vpop.f32.mrf.mxu0  ;;  %v357_v5 = vpop.f32.mrf.mxu1 }
  0xc3   : > { %v604_v6 = vpack.c.bf16 %v333_v4, %v330_v0  ;;  %v624_v7 = vpack.c.bf16 %v357_v5, %v354_v1 }
  0xc5   : > { %672 = vst [vmem:[%s878_s26 + $0x10] sm:$0xff] %v604_v6  }
  0xc6   : > { %676 = vst [vmem:[%s878_s26 + $0x30] sm:$0xff] %v624_v7  }
  0xc9   : > { %v381_v8 = vpop.f32.mrf.mxu2  ;;  %v405_v9 = vpop.f32.mrf.mxu3 }
  0xca   : > { %v644_v10 = vpack.c.bf16 %v381_v8, %v378_v2  ;;  %v664_v11 = vpack.c.bf16 %v405_v9, %v402_v3  ;;  %v336_v12 = vpop.f32.mrf.mxu0  ;;  %v360_v13 = vpop.f32.mrf.mxu1 }
  0xcc   : > { %680 = vst [vmem:[%s878_s26 + $0x50] sm:$0xff] %v644_v10  }
  0xcd   : > { %684 = vst [vmem:[%s878_s26 + $0x70] sm:$0xff] %v664_v11  }
  0xd1   : > { %v384_v14 = vpop.f32.mrf.mxu2  ;;  %v408_v15 = vpop.f32.mrf.mxu3 }
  0xd2   : > { %v339_v16 = vpop.f32.mrf.mxu0  ;;  %v363_v17 = vpop.f32.mrf.mxu1 }
  0xd3   : > { %v609_v18 = vpack.c.bf16 %v339_v16, %v336_v12  ;;  %v629_v19 = vpack.c.bf16 %v363_v17, %v360_v13 }
  0xd5   : > { %673 = vst [vmem:[%s878_s26 + $0x18] sm:$0xff] %v609_v18  }
  0xd6   : > { %677 = vst [vmem:[%s878_s26 + $0x38] sm:$0xff] %v629_v19  }
  0xd9   : > { %v387_v20 = vpop.f32.mrf.mxu2  ;;  %v411_v21 = vpop.f32.mrf.mxu3 }
  0xda   : > { %v649_v22 = vpack.c.bf16 %v387_v20, %v384_v14  ;;  %v669_v23 = vpack.c.bf16 %v411_v21, %v408_v15 }
  0xdc   : > { %681 = vst [vmem:[%s878_s26 + $0x58] sm:$0xff] %v649_v22  }
  0xdd   : > { %685 = vst [vmem:[%s878_s26 + $0x78] sm:$0xff] %v669_v23  }
  0xde PF: > { %s13_s9 = sadd.s32 1, %s771_s9  }
  0xdf   : > { %p10_p7 = scmp.ge.s32.totalorder %s13_s9, 4  }
  0xe1   :  { %12 = sbr.rel (!%p10_p7) target bundleno = 1 (0x1), region = 63 }
  0xe6   :  { %500 = vsyncpa [#allocation3], 1 }
  0xe7   :  { %502 = vsyncpa [#allocation3 + $0x1], 1 }

// kernel: graph_convolution.3
= control target key start
LH: loop header
LB: loop body
LE: loop exit
PB: predicated region body
PF: predicated region fallthrough
CT: control target
= control target key end

     0   :  { %s2105_s0 = inlined_call_operand.vmem [shape: bf16[512,512], index: 0, kind: input, shape index: {}]   ;;  %s2106_s1 = inlined_call_operand.vmem [shape: bf16[512,128], index: 1, kind: input, shape index: {}]   ;;  %s2107_s2 = inlined_call_operand.vmem [shape: f32[1,128], index: 2, kind: input, shape index: {}]   ;;  %s2108_s3 = inlined_call_operand.hbm [shape: f32[512,128], index: 3, kind: output, shape index: {}]  }
   0x1   :  { %2109 = sst [smem:[#allocation7_spill]] %s2105_s0 }
   0x2   :  { %8 = vsyncpa [#allocation5], 0 }
   0x3   :  { %10 = vsyncpa [#allocation5 + $0x1], 0  ;;  %s1720_s12 = smov 0   ;;  %s1722_s13 = smov 0  }
   0x4   :  { %s1724_s14 = smov 0   ;;  %s1726_s15 = smov 0  }
   0x5   :  { %s1728_s16 = smov 0   ;;  %s1730_s17 = smov 0  }
   0x6   :  { %s1732_s18 = smov 0   ;;  %s1734_s19 = smov 0  }
   0x7   :  { %s1736_s20 = smov 0   ;;  %s1738_s21 = smov 0  }
   0x8 LB: > { %s1215_s22 = sadd.s32 4294967295, %s1695_s21   ;;  %s1216_s23 = sadd.s32 4294967294, %s1695_s21   ;;  %s1695_s21 = sphi %s1738_s21, %s16_s21   ;;  %s1691_s20 = sphi %s1736_s20, %s2122_s20   ;;  %s1687_s19 = sphi %s1734_s19, %s2121_s19   ;;  %s1683_s18 = sphi %s1732_s18, %s2120_s18   ;;  %s1679_s17 = sphi %s1730_s17, %s2119_s17   ;;  %s1675_s16 = sphi %s1728_s16, %s2118_s16   ;;  %s1671_s15 = sphi %s1726_s15, %s2117_s15   ;;  %s1667_s14 = sphi %s1724_s14, %s2116_s14   ;;  %s1663_s13 = sphi %s1722_s13, %s2115_s13   ;;  %s1659_s12 = sphi %s1720_s12, %s2114_s12  }
   0x9   : > { %s25_s24 = sadd.s32 1, %s1687_s19  ;;  %s28_s25 = sadd.s32 1, %s1691_s20 }
   0xa   : > { %p26_p0 = scmp.ge.s32.totalorder %s25_s24, 2  ;;  %s37_s26 = sadd.s32 1, %s1675_s16 }
   0xb   : > { %p44_p1 = scmp.ne.s32.totalorder %s1675_s16, %s1671_s15  ;;  %p45_p2 = scmp.eq.s32.totalorder %s1695_s21, 0 }
   0xc   : > { %s2124_s24 = smov (%p26_p0, %s25_s24), 0  ;;  %s2126_s25 = smov (!%p26_p0, %s28_s25), %s1691_s20 }
   0xd   : > { %s33_s27 = ssub.s32 %s1687_s19, %s2124_s24  ;;  %p1783_p3 = por %p45_p2, %p44_p1 }
   0xe   : > { %p30_p4 = scmp.ge.s32.totalorder %s2126_s25, 2  ;;  %s110_s29 = sadd.s32 1, %s1667_s14 }
   0xf   : > { %p120_p5 = scmp.ne.s32.totalorder %s1667_s14, %s1663_s13  ;;  %p121_p6 = scmp.eq.s32.totalorder %s1215_s22, 3 }
  0x10   : > { %s2128_s25 = smov (%p30_p4, %s2126_s25), 0  ;;  %p126_p8 = scmp.ne.s32.totalorder %s1663_s13, %s1659_s12 }
  0x11   : > { %p1792_p7 = por %p121_p6, %p120_p5  ;;  %s32_s4 = ssub.s32 %s1691_s20, %s2128_s25 }
  0x12   : > { %p127_p9 = scmp.eq.s32.totalorder %s1216_s23, 3  ;;  %s34_s5 = sor.u32 %s33_s27, %s32_s4 }
  0x13   : > { %p108_p10 = scmp.eq.s32.totalorder %s32_s4, 0  ;;  %p35_p11 = scmp.eq.s32.totalorder %s34_s5, 0 }
  0x14   : > { %p1800_p12 = por %p127_p9, %p126_p8  ;;  %p1218_p13 = scmp.ge.s32.totalorder %s1695_s21, 4 }
  0x15   : > { %s1805_s7 = scalar_select %p108_p10, %s1667_s14, %s110_s29  }
  0x16   : > { %s1808_s8 = scalar_select %p35_p11, %s1675_s16, %s37_s26  }
  0x17   : > { %146 = sbr.rel (%p1218_p13) target bundleno = 70 (0x46), region = 20 }
  0x1c   : > { %149 = sbr.rel (!%p1783_p3) target bundleno = 70 (0x46), region = 24  ;;  %s151_s9 = sand.u32 (%p1783_p3), 1, %s1675_s16  }
  0x1d   : > { %s1221_s10 = sshll.u32 (%p1783_p3), %s1687_s19, 1  ;;  %s1219_s11 = sshll.u32 (%p1783_p3), %s151_s9, 8 }
  0x1e   : > { %s1428_s22 = sshll.u32 (%p1783_p3), %s1691_s20, 7  ;;  %s2113_s0 = sld [smem:[#allocation7_spill]] (%p1783_p3) }
  0x1f   : > { %s157_s23 = sadd.s32 (%p1783_p3), %s1428_s22, %s1221_s10  ;;  %s1824_s28 = scalar_lea.vmem (%p1783_p3), [#allocation3], %s1219_s11 }
  0x20   : > { %s1223_s27 = sshll.u32 (%p1783_p3), %s157_s23, 2 }
  0x24   : > { %s1819_s26 = scalar_lea.vmem %s2113_s0, %s1223_s27 }
  0x25   : > { %v250_v0 = vld [vmem:[%s1819_s26] sm:$0xff]  ;;  %v252_v1 = vld [vmem:[%s1819_s26 + $0x10] sm:$0xff] }
  0x26   : > { %v254_v2 = vld [vmem:[%s1819_s26 + $0x20] sm:$0xff]  ;;  %251 = vst [vmem:[%s1824_s28] sm:$0xff] %v250_v0  ;;  %v256_v3 = vld [vmem:[%s1819_s26 + $0x30] sm:$0xff] }
  0x27   : > { %253 = vst [vmem:[%s1824_s28 + $0x8] sm:$0xff] %v252_v1  ;;  %v258_v4 = vld [vmem:[%s1819_s26 + $0x40] sm:$0xff]  ;;  %v260_v5 = vld [vmem:[%s1819_s26 + $0x50] sm:$0xff] }
  0x28   : > { %255 = vst [vmem:[%s1824_s28 + $0x10] sm:$0xff] %v254_v2  ;;  %v262_v6 = vld [vmem:[%s1819_s26 + $0x60] sm:$0xff]  ;;  %v264_v7 = vld [vmem:[%s1819_s26 + $0x70] sm:$0xff] }
  0x29   : > { %257 = vst [vmem:[%s1824_s28 + $0x18] sm:$0xff] %v256_v3  ;;  %v266_v8 = vld [vmem:[%s1819_s26 + $0x80] sm:$0xff]  ;;  %v268_v9 = vld [vmem:[%s1819_s26 + $0x90] sm:$0xff] }
  0x2a   : > { %259 = vst [vmem:[%s1824_s28 + $0x20] sm:$0xff] %v258_v4  ;;  %v270_v10 = vld [vmem:[%s1819_s26 + $0xa0] sm:$0xff]  ;;  %v272_v11 = vld [vmem:[%s1819_s26 + $0xb0] sm:$0xff] }
  0x2b   : > { %261 = vst [vmem:[%s1824_s28 + $0x28] sm:$0xff] %v260_v5  ;;  %v274_v12 = vld [vmem:[%s1819_s26 + $0xc0] sm:$0xff]  ;;  %v276_v13 = vld [vmem:[%s1819_s26 + $0xd0] sm:$0xff] }
  0x2c   : > { %263 = vst [vmem:[%s1824_s28 + $0x30] sm:$0xff] %v262_v6  ;;  %v278_v14 = vld [vmem:[%s1819_s26 + $0xe0] sm:$0xff]  ;;  %v280_v15 = vld [vmem:[%s1819_s26 + $0xf0] sm:$0xff] }
  0x2d   : > { %265 = vst [vmem:[%s1824_s28 + $0x38] sm:$0xff] %v264_v7  ;;  %v282_v16 = vld [vmem:[%s1819_s26 + $0x100] sm:$0xff]  ;;  %v284_v17 = vld [vmem:[%s1819_s26 + $0x110] sm:$0xff] }
  0x2e   : > { %267 = vst [vmem:[%s1824_s28 + $0x40] sm:$0xff] %v266_v8  ;;  %v286_v18 = vld [vmem:[%s1819_s26 + $0x120] sm:$0xff]  ;;  %v288_v19 = vld [vmem:[%s1819_s26 + $0x130] sm:$0xff] }
  0x2f   : > { %269 = vst [vmem:[%s1824_s28 + $0x48] sm:$0xff] %v268_v9  ;;  %v290_v20 = vld [vmem:[%s1819_s26 + $0x140] sm:$0xff]  ;;  %v292_v21 = vld [vmem:[%s1819_s26 + $0x150] sm:$0xff] }
  0x30   : > { %271 = vst [vmem:[%s1824_s28 + $0x50] sm:$0xff] %v270_v10  ;;  %v294_v22 = vld [vmem:[%s1819_s26 + $0x160] sm:$0xff]  ;;  %v296_v23 = vld [vmem:[%s1819_s26 + $0x170] sm:$0xff] }
  0x31   : > { %273 = vst [vmem:[%s1824_s28 + $0x58] sm:$0xff] %v272_v11  ;;  %v298_v24 = vld [vmem:[%s1819_s26 + $0x180] sm:$0xff]  ;;  %v300_v25 = vld [vmem:[%s1819_s26 + $0x190] sm:$0xff] }
  0x32   : > { %275 = vst [vmem:[%s1824_s28 + $0x60] sm:$0xff] %v274_v12  ;;  %v302_v26 = vld [vmem:[%s1819_s26 + $0x1a0] sm:$0xff]  ;;  %v304_v27 = vld [vmem:[%s1819_s26 + $0x1b0] sm:$0xff] }
  0x33   : > { %277 = vst [vmem:[%s1824_s28 + $0x68] sm:$0xff] %v276_v13  ;;  %v306_v28 = vld [vmem:[%s1819_s26 + $0x1c0] sm:$0xff]  ;;  %v308_v29 = vld [vmem:[%s1819_s26 + $0x1d0] sm:$0xff] }
  0x34   : > { %279 = vst [vmem:[%s1824_s28 + $0x70] sm:$0xff] %v278_v14  ;;  %v310_v30 = vld [vmem:[%s1819_s26 + $0x1e0] sm:$0xff]  ;;  %v312_v31 = vld [vmem:[%s1819_s26 + $0x1f0] sm:$0xff] }
  0x35   : > { %281 = vst [vmem:[%s1824_s28 + $0x78] sm:$0xff] %v280_v15 }
  0x36   : > { %283 = vst [vmem:[%s1824_s28 + $0x80] sm:$0xff] %v282_v16 }
  0x37   : > { %285 = vst [vmem:[%s1824_s28 + $0x88] sm:$0xff] %v284_v17 }
  0x38   : > { %287 = vst [vmem:[%s1824_s28 + $0x90] sm:$0xff] %v286_v18 }
  0x39   : > { %289 = vst [vmem:[%s1824_s28 + $0x98] sm:$0xff] %v288_v19 }
  0x3a   : > { %291 = vst [vmem:[%s1824_s28 + $0xa0] sm:$0xff] %v290_v20 }
  0x3b   : > { %293 = vst [vmem:[%s1824_s28 + $0xa8] sm:$0xff] %v292_v21 }
  0x3c   : > { %295 = vst [vmem:[%s1824_s28 + $0xb0] sm:$0xff] %v294_v22 }
  0x3d   : > { %297 = vst [vmem:[%s1824_s28 + $0xb8] sm:$0xff] %v296_v23 }
  0x3e   : > { %299 = vst [vmem:[%s1824_s28 + $0xc0] sm:$0xff] %v298_v24 }
  0x3f   : > { %301 = vst [vmem:[%s1824_s28 + $0xc8] sm:$0xff] %v300_v25 }
  0x40   : > { %303 = vst [vmem:[%s1824_s28 + $0xd0] sm:$0xff] %v302_v26 }
  0x41   : > { %305 = vst [vmem:[%s1824_s28 + $0xd8] sm:$0xff] %v304_v27 }
  0x42   : > { %307 = vst [vmem:[%s1824_s28 + $0xe0] sm:$0xff] %v306_v28 }
  0x43   : > { %309 = vst [vmem:[%s1824_s28 + $0xe8] sm:$0xff] %v308_v29 }
  0x44   : > { %311 = vst [vmem:[%s1824_s28 + $0xf0] sm:$0xff] %v310_v30 }
  0x45   : > { %313 = vst [vmem:[%s1824_s28 + $0xf8] sm:$0xff] %v312_v31 }
  0x46 PF: > { %p1224_p0 = scmp.ge.s32.totalorder %s1695_s21, 1  ;;  %p327_p1 = scmp.lt.s32.totalorder %s1695_s21, 5 }
  0x48   : > { %p328_p2 = pnand %p1224_p0, %p327_p1 }
  0x49   : > { %s334_s5 = sand.u32 (!%p328_p2), 1, %s1671_s15   ;;  %s359_s9 = sand.u32 (!%p328_p2), 1, %s1663_s13  }
  0x4a   : > { %331 = sbr.rel (%p328_p2) target bundleno = 458 (0x1ca), region = 66  ;;  %s1225_s10 = sshll.u32 (!%p328_p2), %s334_s5, 8 }
  0x4b   : > { %s1226_s11 = sshll.u32 (!%p328_p2), %s359_s9, 8  ;;  %s1227_s22 = sshll.u32 (!%p328_p2), %s1679_s17, 5 }
  0x4c   : > { %p365_p3 = scmp.lt.s32.totalorder (!%p328_p2), %s1227_s22, 63  ;;  %s1899_s26 = scalar_lea.vmem (!%p328_p2), [#allocation3], %s1225_s10 }
  0x4d   : > { %s1901_s28 = scalar_lea.vmem (!%p328_p2), [#allocation4], %s1226_s11  ;;  %p1229_p4 = scmp.ne.s32.totalorder (!%p328_p2), %s1679_s17, 0 }
  0x4f   : > { %s2130_s22 = smov (!%p365_p3, %s1227_s22), 63  ;;  %374 = sbr.rel (%p1229_p4) target bundleno = 117 (0x75), region = 74 }
  0x50   : > { %s1228_s23 = sshll.u32 %s2130_s22, 2 }
  0x51   : > { %s1897_s29 = scalar_lea.vmem %s2106_s1, %s1228_s23 }
  0x54   : > { %v1697_v32 = vmov 0.0  }
  0x55   : > { %375 = vst [vmem:[#allocation2 + $0xb0] sm:$0xff] %v1697_v32 }
  0x56   : > { %376 = vst [vmem:[#allocation2] sm:$0xff] %v1697_v32 }
  0x57   : > { %377 = vst [vmem:[#allocation2 + $0xd8] sm:$0xff] %v1697_v32 }
  0x58   : > { %378 = vst [vmem:[#allocation2 + $0x18] sm:$0xff] %v1697_v32 }
  0x59   : > { %379 = vst [vmem:[#allocation2 + $0x50] sm:$0xff] %v1697_v32 }
  0x5a   : > { %380 = vst [vmem:[#allocation2 + $0x68] sm:$0xff] %v1697_v32 }
  0x5b   : > { %381 = vst [vmem:[#allocation2 + $0x30] sm:$0xff] %v1697_v32 }
  0x5c   : > { %382 = vst [vmem:[#allocation2 + $0x48] sm:$0xff] %v1697_v32 }
  0x5d   : > { %383 = vst [vmem:[#allocation2 + $0x80] sm:$0xff] %v1697_v32 }
  0x5e   : > { %384 = vst [vmem:[#allocation2 + $0x88] sm:$0xff] %v1697_v32 }
  0x5f   : > { %385 = vst [vmem:[#allocation2 + $0xe8] sm:$0xff] %v1697_v32 }
  0x60   : > { %386 = vst [vmem:[#allocation2 + $0xb8] sm:$0xff] %v1697_v32 }
  0x61   : > { %387 = vst [vmem:[#allocation2 + $0x60] sm:$0xff] %v1697_v32 }
  0x62   : > { %388 = vst [vmem:[#allocation2 + $0xf0] sm:$0xff] %v1697_v32 }
  0x63   : > { %389 = vst [vmem:[#allocation2 + $0x8] sm:$0xff] %v1697_v32 }
  0x64   : > { %390 = vst [vmem:[#allocation2 + $0x78] sm:$0xff] %v1697_v32 }
  0x65   : > { %391 = vst [vmem:[#allocation2 + $0x38] sm:$0xff] %v1697_v32 }
  0x66   : > { %392 = vst [vmem:[#allocation2 + $0x58] sm:$0xff] %v1697_v32 }
  0x67   : > { %393 = vst [vmem:[#allocation2 + $0x40] sm:$0xff] %v1697_v32 }
  0x68   : > { %394 = vst [vmem:[#allocation2 + $0xc8] sm:$0xff] %v1697_v32 }
  0x69   : > { %395 = vst [vmem:[#allocation2 + $0xe0] sm:$0xff] %v1697_v32 }
  0x6a   : > { %396 = vst [vmem:[#allocation2 + $0x90] sm:$0xff] %v1697_v32 }
  0x6b   : > { %397 = vst [vmem:[#allocation2 + $0x70] sm:$0xff] %v1697_v32 }
  0x6c   : > { %398 = vst [vmem:[#allocation2 + $0xc0] sm:$0xff] %v1697_v32 }
  0x6d   : > { %399 = vst [vmem:[#allocation2 + $0xa8] sm:$0xff] %v1697_v32 }
  0x6e   : > { %400 = vst [vmem:[#allocation2 + $0xd0] sm:$0xff] %v1697_v32 }
  0x6f   : > { %401 = vst [vmem:[#allocation2 + $0x10] sm:$0xff] %v1697_v32 }
  0x70   : > { %402 = vst [vmem:[#allocation2 + $0x28] sm:$0xff] %v1697_v32 }
  0x71   : > { %403 = vst [vmem:[#allocation2 + $0xa0] sm:$0xff] %v1697_v32 }
  0x72   : > { %404 = vst [vmem:[#allocation2 + $0xf8] sm:$0xff] %v1697_v32 }
  0x73   : > { %405 = vst [vmem:[#allocation2 + $0x20] sm:$0xff] %v1697_v32 }
  0x74   : > { %406 = vst [vmem:[#allocation2 + $0x98] sm:$0xff] %v1697_v32 }
  0x75 PF: > { %v1468_v33 = vld [vmem:[%s1897_s29 + $0x38] sm:$0xff]  ;;  %v1467_v35 = vld [vmem:[%s1897_s29 + $0x30] sm:$0xff]  ;;  %v1466_v37 = vld [vmem:[%s1897_s29 + $0x28] sm:$0xff]  ;;  %p1422_p5 = scmp.ne.s32.totalorder %s1679_s17, 1 }
  0x76   : > { %v1476_v34 = vld [vmem:[%s1897_s29 + $0x78] sm:$0xff]  ;;  %759 = vmatpush.bf16.msra.mxu0 %v1468_v33  ;;  %1478 = vmatpush.bf16.msra.mxu2 %v1468_v33  ;;  %v1475_v36 = vld [vmem:[%s1897_s29 + $0x70] sm:$0xff]  ;;  %v1474_v38 = vld [vmem:[%s1897_s29 + $0x68] sm:$0xff] }
  0x77   : > { %848 = vmatpush.bf16.msra.mxu1 %v1476_v34  ;;  %1486 = vmatpush.bf16.msra.mxu3 %v1476_v34  ;;  %v1465_v39 = vld [vmem:[%s1897_s29 + $0x20] sm:$0xff]  ;;  %v1464_v41 = vld [vmem:[%s1897_s29 + $0x18] sm:$0xff]  ;;  %v1463_v43 = vld [vmem:[%s1897_s29 + $0x10] sm:$0xff] }
  0x78   : > { %v1473_v40 = vld [vmem:[%s1897_s29 + $0x60] sm:$0xff]  ;;  %v1472_v42 = vld [vmem:[%s1897_s29 + $0x58] sm:$0xff]  ;;  %v1471_v44 = vld [vmem:[%s1897_s29 + $0x50] sm:$0xff] }
  0x79   : > { %v1462_v45 = vld [vmem:[%s1897_s29 + $0x8] sm:$0xff]  ;;  %v1461_v47 = vld [vmem:[%s1897_s29] sm:$0xff]  ;;  %v1240_v61 = vld [vmem:[%s1899_s26 + $0x10] sm:$0xf] }
  0x7a   : > { %760 = vmatpush.bf16.msra.mxu0 %v1467_v35  ;;  %1479 = vmatpush.bf16.msra.mxu2 %v1467_v35  ;;  %v1470_v46 = vld [vmem:[%s1897_s29 + $0x48] sm:$0xff]  ;;  %v1469_v48 = vld [vmem:[%s1897_s29 + $0x40] sm:$0xff]  ;;  %v1432_v62 = vld [vmem:[%s1899_s26 + $0x14] sm:$0xf0] }
  0x7b   : > { %849 = vmatpush.bf16.msra.mxu1 %v1475_v36  ;;  %1487 = vmatpush.bf16.msra.mxu3 %v1475_v36  ;;  %v1232_v49 = vld [vmem:[%s1899_s26] sm:$0xf]  ;;  %v1430_v50 = vld [vmem:[%s1899_s26 + $0x4] sm:$0xf0]  ;;  %v1429_v53 = vld [vmem:[%s1899_s26 + $0x4] sm:$0xf]  ;;  %v1241_v5 = vor.u32 %v1432_v62, %v1240_v61 }
  0x7c   : > { %v1296_v51 = vld [vmem:[%s1899_s26 + $0x80] sm:$0xf]  ;;  %v1446_v52 = vld [vmem:[%s1899_s26 + $0x84] sm:$0xf0]  ;;  %v1234_v54 = vld [vmem:[%s1899_s26 + $0x8] sm:$0xf0]  ;;  %v1233_v57 = vor.u32 %v1430_v50, %v1232_v49 }
  0x7d   : > { %v1445_v55 = vld [vmem:[%s1899_s26 + $0x84] sm:$0xf]  ;;  %v1298_v56 = vld [vmem:[%s1899_s26 + $0x88] sm:$0xf0]  ;;  %v1297_v58 = vor.u32 %v1446_v52, %v1296_v51  ;;  %v1237_v59 = vor.u32 %v1429_v53, %v1234_v54  ;;  %v1304_v63 = vld [vmem:[%s1899_s26 + $0x90] sm:$0xf] }
  0x7e   : > { %761 = vmatpush.bf16.msra.mxu0 %v1466_v37  ;;  %1480 = vmatpush.bf16.msra.mxu2 %v1466_v37  ;;  %v1301_v60 = vor.u32 %v1445_v55, %v1298_v56  ;;  %v1448_v0 = vld [vmem:[%s1899_s26 + $0x94] sm:$0xf0]  ;;  %v1431_v1 = vld [vmem:[%s1899_s26 + $0x14] sm:$0xf]  ;;  %v1242_v2 = vld [vmem:[%s1899_s26 + $0x18] sm:$0xf0] }
  0x7f   : > { %850 = vmatpush.bf16.msra.mxu1 %v1474_v38  ;;  %1488 = vmatpush.bf16.msra.mxu3 %v1474_v38  ;;  %v1447_v3 = vld [vmem:[%s1899_s26 + $0x94] sm:$0xf]  ;;  %v1306_v4 = vld [vmem:[%s1899_s26 + $0x98] sm:$0xf0]  ;;  %v1305_v6 = vor.u32 %v1448_v0, %v1304_v63  ;;  %v1245_v7 = vor.u32 %v1431_v1, %v1242_v2  ;;  %v1248_v9 = vld [vmem:[%s1899_s26 + $0x20] sm:$0xf] }
  0x80   : > { %v1309_v8 = vor.u32 %v1447_v3, %v1306_v4  ;;  %v1434_v10 = vld [vmem:[%s1899_s26 + $0x24] sm:$0xf0]  ;;  %v1312_v11 = vld [vmem:[%s1899_s26 + $0xa0] sm:$0xf]  ;;  %v1433_v13 = vld [vmem:[%s1899_s26 + $0x24] sm:$0xf] }
  0x81   : > { %v1450_v12 = vld [vmem:[%s1899_s26 + $0xa4] sm:$0xf0]  ;;  %v1250_v14 = vld [vmem:[%s1899_s26 + $0x28] sm:$0xf0]  ;;  %v1449_v15 = vld [vmem:[%s1899_s26 + $0xa4] sm:$0xf]  ;;  %v1249_v17 = vor.u32 %v1434_v10, %v1248_v9 }
  0x82   : > { %762 = vmatpush.bf16.msra.mxu0 %v1465_v39  ;;  %1481 = vmatpush.bf16.msra.mxu2 %v1465_v39  ;;  %v1314_v16 = vld [vmem:[%s1899_s26 + $0xa8] sm:$0xf0]  ;;  %v1313_v18 = vor.u32 %v1450_v12, %v1312_v11  ;;  %v1253_v19 = vor.u32 %v1433_v13, %v1250_v14  ;;  %v1256_v21 = vld [vmem:[%s1899_s26 + $0x30] sm:$0xf]  ;;  %v1436_v22 = vld [vmem:[%s1899_s26 + $0x34] sm:$0xf0] }
  0x83   : > { %851 = vmatpush.bf16.msra.mxu1 %v1473_v40  ;;  %1489 = vmatpush.bf16.msra.mxu3 %v1473_v40  ;;  %v1317_v20 = vor.u32 %v1449_v15, %v1314_v16  ;;  %v1320_v23 = vld [vmem:[%s1899_s26 + $0xb0] sm:$0xf]  ;;  %v1452_v24 = vld [vmem:[%s1899_s26 + $0xb4] sm:$0xf0]  ;;  %v1435_v25 = vld [vmem:[%s1899_s26 + $0x34] sm:$0xf]  ;;  %v1257_v29 = vor.u32 %v1436_v22, %v1256_v21 }
  0x84   : > { %v1258_v26 = vld [vmem:[%s1899_s26 + $0x38] sm:$0xf0]  ;;  %v1451_v27 = vld [vmem:[%s1899_s26 + $0xb4] sm:$0xf]  ;;  %v1321_v30 = vor.u32 %v1452_v24, %v1320_v23  ;;  %v1264_v33 = vld [vmem:[%s1899_s26 + $0x40] sm:$0xf] }
  0x85   : > { %v1322_v28 = vld [vmem:[%s1899_s26 + $0xb8] sm:$0xf0]  ;;  %v1261_v31 = vor.u32 %v1435_v25, %v1258_v26  ;;  %v1438_v34 = vld [vmem:[%s1899_s26 + $0x44] sm:$0xf0]  ;;  %v1328_v35 = vld [vmem:[%s1899_s26 + $0xc0] sm:$0xf] }
  0x86   : > { %763 = vmatpush.bf16.msra.mxu0 %v1464_v41  ;;  %1482 = vmatpush.bf16.msra.mxu2 %v1464_v41  ;;  %v1325_v32 = vor.u32 %v1451_v27, %v1322_v28  ;;  %v1454_v36 = vld [vmem:[%s1899_s26 + $0xc4] sm:$0xf0]  ;;  %v1437_v37 = vld [vmem:[%s1899_s26 + $0x44] sm:$0xf]  ;;  %v1266_v38 = vld [vmem:[%s1899_s26 + $0x48] sm:$0xf0]  ;;  %v1265_v41 = vor.u32 %v1438_v34, %v1264_v33 }
  0x87   : > { %852 = vmatpush.bf16.msra.mxu1 %v1472_v42  ;;  %1490 = vmatpush.bf16.msra.mxu3 %v1472_v42  ;;  %v1453_v39 = vld [vmem:[%s1899_s26 + $0xc4] sm:$0xf]  ;;  %v1330_v40 = vld [vmem:[%s1899_s26 + $0xc8] sm:$0xf0]  ;;  %v1329_v42 = vor.u32 %v1454_v36, %v1328_v35  ;;  %v1439_v49 = vld [vmem:[%s1899_s26 + $0x54] sm:$0xf] }
  0x88   : > { %v1274_v50 = vld [vmem:[%s1899_s26 + $0x58] sm:$0xf0]  ;;  %v1455_v51 = vld [vmem:[%s1899_s26 + $0xd4] sm:$0xf]  ;;  %v1441_v61 = vld [vmem:[%s1899_s26 + $0x64] sm:$0xf] }
  0x89   : > { %v1338_v52 = vld [vmem:[%s1899_s26 + $0xd8] sm:$0xf0]  ;;  %v1277_v55 = vor.u32 %v1439_v49, %v1274_v50  ;;  %v1282_v62 = vld [vmem:[%s1899_s26 + $0x68] sm:$0xf0]  ;;  %v1457_v63 = vld [vmem:[%s1899_s26 + $0xe4] sm:$0xf] }
  0x8a   : > { %764 = vmatpush.bf16.msra.mxu0 %v1463_v43  ;;  %1483 = vmatpush.bf16.msra.mxu2 %v1463_v43  ;;  %v1269_v43 = vor.u32 %v1437_v37, %v1266_v38  ;;  %v1341_v56 = vor.u32 %v1455_v51, %v1338_v52  ;;  %v1346_v0 = vld [vmem:[%s1899_s26 + $0xe8] sm:$0xf0]  ;;  %v1285_v3 = vor.u32 %v1441_v61, %v1282_v62  ;;  %v1443_v9 = vld [vmem:[%s1899_s26 + $0x74] sm:$0xf]  ;;  %v1290_v10 = vld [vmem:[%s1899_s26 + $0x78] sm:$0xf0] }
  0x8b   : > { %853 = vmatpush.bf16.msra.mxu1 %v1471_v44  ;;  %1491 = vmatpush.bf16.msra.mxu3 %v1471_v44  ;;  %v1333_v44 = vor.u32 %v1453_v39, %v1330_v40  ;;  %v1349_v4 = vor.u32 %v1457_v63, %v1346_v0  ;;  %v1459_v11 = vld [vmem:[%s1899_s26 + $0xf4] sm:$0xf]  ;;  %v1354_v12 = vld [vmem:[%s1899_s26 + $0xf8] sm:$0xf0]  ;;  %v1293_v15 = vor.u32 %v1443_v9, %v1290_v10  ;;  %v408_v27 = vld [vmem:[#allocation2] sm:$0xff] }
  0x8c   : > { %v1357_v16 = vor.u32 %v1459_v11, %v1354_v12  ;;  %v423_v23 = vld [vmem:[#allocation2 + $0x38] sm:$0xff]  ;;  %v427_v63 = vld [vmem:[#allocation2 + $0xe0] sm:$0xff]  ;;  %v428_v9 = vld [vmem:[#allocation2 + $0x90] sm:$0xff] }
  0x8d   : > { %v424_v33 = vld [vmem:[#allocation2 + $0x58] sm:$0xff] }
  0x8e   : > { %765 = vmatpush.bf16.msra.mxu0 %v1462_v45  ;;  %1484 = vmatpush.bf16.msra.mxu2 %v1462_v45  ;;  %v1272_v45 = vld [vmem:[%s1899_s26 + $0x50] sm:$0xf]  ;;  %v409_v37 = vld [vmem:[#allocation2 + $0xd8] sm:$0xff] }
  0x8f   : > { %854 = vmatpush.bf16.msra.mxu1 %v1470_v46  ;;  %1492 = vmatpush.bf16.msra.mxu3 %v1470_v46  ;;  %v1440_v46 = vld [vmem:[%s1899_s26 + $0x54] sm:$0xf0] }
  0x90   : > { %v1273_v53 = vor.u32 %v1440_v46, %v1272_v45 }
  0x92   : > { %766 = vmatpush.bf16.msra.mxu0 %v1461_v47  ;;  %1485 = vmatpush.bf16.msra.mxu2 %v1461_v47  ;;  %v1336_v47 = vld [vmem:[%s1899_s26 + $0xd0] sm:$0xf] }
  0x93   : > { %855 = vmatpush.bf16.msra.mxu1 %v1469_v48  ;;  %1493 = vmatpush.bf16.msra.mxu3 %v1469_v48  ;;  %v1456_v48 = vld [vmem:[%s1899_s26 + $0xd4] sm:$0xf0] }
  0x94   : > { %v1337_v54 = vor.u32 %v1456_v48, %v1336_v47  ;;  %v410_v47 = vld [vmem:[#allocation2 + $0x18] sm:$0xff] }
  0x95   : > { %767 = vmatmul.bf16.vlgmr.msra.gmra.mxu0 %v1233_v57  ;;  %807 = vmatmul.bf16.vlgmr.msra.gmra.mxu2 %v1297_v58  ;;  %v1280_v57 = vld [vmem:[%s1899_s26 + $0x60] sm:$0xf]  ;;  %v1442_v58 = vld [vmem:[%s1899_s26 + $0x64] sm:$0xf0] }
  0x96   : > { %856 = vmatmul.bf16.vlgmr.msra.gmra.mxu1 %v1237_v59  ;;  %896 = vmatmul.bf16.vlgmr.msra.gmra.mxu3 %v1301_v60  ;;  %v1344_v59 = vld [vmem:[%s1899_s26 + $0xe0] sm:$0xf]  ;;  %v1458_v60 = vld [vmem:[%s1899_s26 + $0xe4] sm:$0xf0]  ;;  %v1281_v1 = vor.u32 %v1442_v58, %v1280_v57  ;;  %v411_v57 = vld [vmem:[#allocation2 + $0x50] sm:$0xff] }
  0x97   : > { %v1345_v2 = vor.u32 %v1458_v60, %v1344_v59 }
  0xa5   : > { %772 = vmatmul.bf16.gmra.mxu0 %v1241_v5  ;;  %812 = vmatmul.bf16.gmra.mxu2 %v1305_v6  ;;  %v1288_v5 = vld [vmem:[%s1899_s26 + $0x70] sm:$0xf]  ;;  %v1444_v6 = vld [vmem:[%s1899_s26 + $0x74] sm:$0xf0] }
  0xa6   : > { %861 = vmatmul.bf16.gmra.mxu1 %v1245_v7  ;;  %901 = vmatmul.bf16.gmra.mxu3 %v1309_v8  ;;  %v1352_v7 = vld [vmem:[%s1899_s26 + $0xf0] sm:$0xf]  ;;  %v1460_v8 = vld [vmem:[%s1899_s26 + $0xf4] sm:$0xf0]  ;;  %v1289_v13 = vor.u32 %v1444_v6, %v1288_v5 }
  0xa7   : > { %v1353_v14 = vor.u32 %v1460_v8, %v1352_v7 }
  0xb5   : > { %777 = vmatmul.bf16.gmra.mxu0 %v1249_v17  ;;  %817 = vmatmul.bf16.gmra.mxu2 %v1313_v18  ;;  %v407_v18 = vld [vmem:[#allocation2 + $0xb0] sm:$0xff] }
  0xb6   : > { %866 = vmatmul.bf16.gmra.mxu1 %v1253_v19  ;;  %906 = vmatmul.bf16.gmra.mxu3 %v1317_v20 }
  0xc5   : > { %782 = vmatmul.bf16.gmra.mxu0 %v1257_v29  ;;  %822 = vmatmul.bf16.gmra.mxu2 %v1321_v30 }
  0xc6   : > { %871 = vmatmul.bf16.gmra.mxu1 %v1261_v31  ;;  %911 = vmatmul.bf16.gmra.mxu3 %v1325_v32 }
  0xd5   : > { %787 = vmatmul.bf16.gmra.mxu0 %v1265_v41  ;;  %827 = vmatmul.bf16.gmra.mxu2 %v1329_v42 }
  0xd6   : > { %876 = vmatmul.bf16.gmra.mxu1 %v1269_v43  ;;  %916 = vmatmul.bf16.gmra.mxu3 %v1333_v44  ;;  %v425_v43 = vld [vmem:[#allocation2 + $0x40] sm:$0xff] }
  0xe5   : > { %792 = vmatmul.bf16.gmra.mxu0 %v1273_v53  ;;  %832 = vmatmul.bf16.gmra.mxu2 %v1337_v54  ;;  %v426_v53 = vld [vmem:[#allocation2 + $0xc8] sm:$0xff] }
  0xe6   : > { %881 = vmatmul.bf16.gmra.mxu1 %v1277_v55  ;;  %921 = vmatmul.bf16.gmra.mxu3 %v1341_v56 }
  0xf5   : > { %797 = vmatmul.bf16.gmra.mxu0 %v1281_v1  ;;  %837 = vmatmul.bf16.gmra.mxu2 %v1345_v2 }
  0xf6   : > { %886 = vmatmul.bf16.gmra.mxu1 %v1285_v3  ;;  %926 = vmatmul.bf16.gmra.mxu3 %v1349_v4  ;;  %v412_v3 = vld [vmem:[#allocation2 + $0x68] sm:$0xff] }
 0x105   : > { %802 = vmatmul.bf16.gmra.mxu0 %v1289_v13  ;;  %842 = vmatmul.bf16.gmra.mxu2 %v1353_v14  ;;  %v413_v13 = vld [vmem:[#allocation2 + $0x30] sm:$0xff] }
 0x106   : > { %891 = vmatmul.bf16.gmra.mxu1 %v1293_v15  ;;  %931 = vmatmul.bf16.gmra.mxu3 %v1357_v16 }
 0x112   : > { %v768_v17 = vpop.f32.mrf.mxu0 }
 0x113   : > { %v857_v19 = vpop.f32.mrf.mxu1 }
 0x114   : > { %v858_v20 = vadd.f32 %v857_v19, %v768_v17  ;;  %v429_v19 = vld [vmem:[#allocation2 + $0x70] sm:$0xff] }
 0x116   : > { %v937_v21 = vadd.f32 %v858_v20, %v407_v18 }
 0x118   : > { %969 = vst [vmem:[#allocation2 + $0xb0] sm:$0xff] %v937_v21  ;;  %v808_v22 = vpop.f32.mrf.mxu2 }
 0x119   : > { %v897_v24 = vpop.f32.mrf.mxu3 }
 0x11a   : > { %v898_v25 = vadd.f32 %v897_v24, %v808_v22  ;;  %v770_v26 = vpop.f32.mrf.mxu0 }
 0x11b   : > { %v859_v28 = vpop.f32.mrf.mxu1 }
 0x11c   : > { %v953_v29 = vadd.f32 %v898_v25, %v423_v23  ;;  %v860_v30 = vadd.f32 %v859_v28, %v770_v26  ;;  %v414_v23 = vld [vmem:[#allocation2 + $0x48] sm:$0xff] }
 0x11e   : > { %985 = vst [vmem:[#allocation2 + $0x38] sm:$0xff] %v953_v29  ;;  %v938_v31 = vadd.f32 %v860_v30, %v408_v27  ;;  %v430_v29 = vld [vmem:[#allocation2 + $0xc0] sm:$0xff] }
 0x120   : > { %970 = vst [vmem:[#allocation2] sm:$0xff] %v938_v31  ;;  %v810_v32 = vpop.f32.mrf.mxu2 }
 0x121   : > { %v899_v34 = vpop.f32.mrf.mxu3 }
 0x122   : > { %v900_v35 = vadd.f32 %v899_v34, %v810_v32  ;;  %v773_v36 = vpop.f32.mrf.mxu0 }
 0x123   : > { %v862_v38 = vpop.f32.mrf.mxu1 }
 0x124   : > { %v954_v39 = vadd.f32 %v900_v35, %v424_v33  ;;  %v863_v40 = vadd.f32 %v862_v38, %v773_v36  ;;  %v415_v33 = vld [vmem:[#allocation2 + $0x80] sm:$0xff] }
 0x126   : > { %986 = vst [vmem:[#allocation2 + $0x58] sm:$0xff] %v954_v39  ;;  %v939_v41 = vadd.f32 %v863_v40, %v409_v37  ;;  %v431_v39 = vld [vmem:[#allocation2 + $0xa8] sm:$0xff] }
 0x128   : > { %971 = vst [vmem:[#allocation2 + $0xd8] sm:$0xff] %v939_v41  ;;  %v813_v42 = vpop.f32.mrf.mxu2 }
 0x129   : > { %v902_v44 = vpop.f32.mrf.mxu3 }
 0x12a   : > { %v903_v45 = vadd.f32 %v902_v44, %v813_v42  ;;  %v775_v46 = vpop.f32.mrf.mxu0 }
 0x12b   : > { %v864_v48 = vpop.f32.mrf.mxu1 }
 0x12c   : > { %v955_v49 = vadd.f32 %v903_v45, %v425_v43  ;;  %v865_v50 = vadd.f32 %v864_v48, %v775_v46  ;;  %v416_v43 = vld [vmem:[#allocation2 + $0x88] sm:$0xff] }
 0x12e   : > { %987 = vst [vmem:[#allocation2 + $0x40] sm:$0xff] %v955_v49  ;;  %v940_v51 = vadd.f32 %v865_v50, %v410_v47  ;;  %v432_v49 = vld [vmem:[#allocation2 + $0xd0] sm:$0xff] }
 0x130   : > { %972 = vst [vmem:[#allocation2 + $0x18] sm:$0xff] %v940_v51  ;;  %v815_v52 = vpop.f32.mrf.mxu2 }
 0x131   : > { %v904_v54 = vpop.f32.mrf.mxu3 }
 0x132   : > { %v905_v55 = vadd.f32 %v904_v54, %v815_v52  ;;  %v778_v56 = vpop.f32.mrf.mxu0 }
 0x133   : > { %v867_v58 = vpop.f32.mrf.mxu1 }
 0x134   : > { %v956_v59 = vadd.f32 %v905_v55, %v426_v53  ;;  %v868_v60 = vadd.f32 %v867_v58, %v778_v56  ;;  %v417_v53 = vld [vmem:[#allocation2 + $0xe8] sm:$0xff] }
 0x136   : > { %988 = vst [vmem:[#allocation2 + $0xc8] sm:$0xff] %v956_v59  ;;  %v941_v61 = vadd.f32 %v868_v60, %v411_v57  ;;  %v433_v59 = vld [vmem:[#allocation2 + $0x10] sm:$0xff] }
 0x138   : > { %973 = vst [vmem:[#allocation2 + $0x50] sm:$0xff] %v941_v61  ;;  %v818_v62 = vpop.f32.mrf.mxu2 }
 0x139   : > { %v907_v0 = vpop.f32.mrf.mxu3 }
 0x13a   : > { %v908_v1 = vadd.f32 %v907_v0, %v818_v62  ;;  %v780_v2 = vpop.f32.mrf.mxu0 }
 0x13b   : > { %v869_v4 = vpop.f32.mrf.mxu1 }
 0x13c   : > { %v957_v5 = vadd.f32 %v908_v1, %v427_v63  ;;  %v870_v6 = vadd.f32 %v869_v4, %v780_v2  ;;  %v418_v63 = vld [vmem:[#allocation2 + $0xb8] sm:$0xff] }
 0x13e   : > { %989 = vst [vmem:[#allocation2 + $0xe0] sm:$0xff] %v957_v5  ;;  %v942_v7 = vadd.f32 %v870_v6, %v412_v3  ;;  %v434_v5 = vld [vmem:[#allocation2 + $0x28] sm:$0xff] }
 0x140   : > { %974 = vst [vmem:[#allocation2 + $0x68] sm:$0xff] %v942_v7  ;;  %v820_v8 = vpop.f32.mrf.mxu2 }
 0x141   : > { %v909_v10 = vpop.f32.mrf.mxu3 }
 0x142   : > { %v910_v11 = vadd.f32 %v909_v10, %v820_v8  ;;  %v783_v12 = vpop.f32.mrf.mxu0 }
 0x143   : > { %v872_v14 = vpop.f32.mrf.mxu1 }
 0x144   : > { %v958_v15 = vadd.f32 %v910_v11, %v428_v9  ;;  %v873_v16 = vadd.f32 %v872_v14, %v783_v12  ;;  %v419_v9 = vld [vmem:[#allocation2 + $0x60] sm:$0xff] }
 0x146   : > { %990 = vst [vmem:[#allocation2 + $0x90] sm:$0xff] %v958_v15  ;;  %v943_v17 = vadd.f32 %v873_v16, %v413_v13  ;;  %v435_v15 = vld [vmem:[#allocation2 + $0xa0] sm:$0xff] }
 0x148   : > { %975 = vst [vmem:[#allocation2 + $0x30] sm:$0xff] %v943_v17  ;;  %v823_v18 = vpop.f32.mrf.mxu2 }
 0x149   : > { %v912_v20 = vpop.f32.mrf.mxu3 }
 0x14a   : > { %v913_v21 = vadd.f32 %v912_v20, %v823_v18  ;;  %v785_v22 = vpop.f32.mrf.mxu0 }
 0x14b   : > { %v874_v24 = vpop.f32.mrf.mxu1 }
 0x14c   : > { %v959_v25 = vadd.f32 %v913_v21, %v429_v19  ;;  %v875_v26 = vadd.f32 %v874_v24, %v785_v22  ;;  %v420_v19 = vld [vmem:[#allocation2 + $0xf0] sm:$0xff] }
 0x14e   : > { %991 = vst [vmem:[#allocation2 + $0x70] sm:$0xff] %v959_v25  ;;  %v944_v27 = vadd.f32 %v875_v26, %v414_v23  ;;  %v436_v25 = vld [vmem:[#allocation2 + $0xf8] sm:$0xff] }
 0x150   : > { %976 = vst [vmem:[#allocation2 + $0x48] sm:$0xff] %v944_v27  ;;  %v825_v28 = vpop.f32.mrf.mxu2 }
 0x151   : > { %v914_v30 = vpop.f32.mrf.mxu3 }
 0x152   : > { %v915_v31 = vadd.f32 %v914_v30, %v825_v28  ;;  %v788_v32 = vpop.f32.mrf.mxu0 }
 0x153   : > { %v877_v34 = vpop.f32.mrf.mxu1 }
 0x154   : > { %v960_v35 = vadd.f32 %v915_v31, %v430_v29  ;;  %v878_v36 = vadd.f32 %v877_v34, %v788_v32  ;;  %v421_v29 = vld [vmem:[#allocation2 + $0x8] sm:$0xff] }
 0x156   : > { %992 = vst [vmem:[#allocation2 + $0xc0] sm:$0xff] %v960_v35  ;;  %v945_v37 = vadd.f32 %v878_v36, %v415_v33  ;;  %v437_v35 = vld [vmem:[#allocation2 + $0x20] sm:$0xff] }
 0x158   : > { %977 = vst [vmem:[#allocation2 + $0x80] sm:$0xff] %v945_v37  ;;  %v828_v38 = vpop.f32.mrf.mxu2 }
 0x159   : > { %v917_v40 = vpop.f32.mrf.mxu3 }
 0x15a   : > { %v918_v41 = vadd.f32 %v917_v40, %v828_v38  ;;  %v790_v42 = vpop.f32.mrf.mxu0 }
 0x15b   : > { %v879_v44 = vpop.f32.mrf.mxu1 }
 0x15c   : > { %v961_v45 = vadd.f32 %v918_v41, %v431_v39  ;;  %v880_v46 = vadd.f32 %v879_v44, %v790_v42  ;;  %v422_v39 = vld [vmem:[#allocation2 + $0x78] sm:$0xff] }
 0x15e   : > { %993 = vst [vmem:[#allocation2 + $0xa8] sm:$0xff] %v961_v45  ;;  %v946_v47 = vadd.f32 %v880_v46, %v416_v43  ;;  %v438_v45 = vld [vmem:[#allocation2 + $0x98] sm:$0xff] }
 0x160   : > { %978 = vst [vmem:[#allocation2 + $0x88] sm:$0xff] %v946_v47  ;;  %v830_v48 = vpop.f32.mrf.mxu2 }
 0x161   : > { %v919_v50 = vpop.f32.mrf.mxu3 }
 0x162   : > { %v920_v51 = vadd.f32 %v919_v50, %v830_v48  ;;  %v793_v52 = vpop.f32.mrf.mxu0 }
 0x163   : > { %v882_v54 = vpop.f32.mrf.mxu1 }
 0x164   : > { %v962_v55 = vadd.f32 %v920_v51, %v432_v49  ;;  %v883_v56 = vadd.f32 %v882_v54, %v793_v52 }
 0x166   : > { %994 = vst [vmem:[#allocation2 + $0xd0] sm:$0xff] %v962_v55  ;;  %v947_v57 = vadd.f32 %v883_v56, %v417_v53 }
 0x168   : > { %979 = vst [vmem:[#allocation2 + $0xe8] sm:$0xff] %v947_v57  ;;  %v833_v58 = vpop.f32.mrf.mxu2 }
 0x169   : > { %v922_v60 = vpop.f32.mrf.mxu3 }
 0x16a   : > { %v923_v61 = vadd.f32 %v922_v60, %v833_v58  ;;  %v795_v62 = vpop.f32.mrf.mxu0 }
 0x16b   : > { %v884_v0 = vpop.f32.mrf.mxu1 }
 0x16c   : > { %v963_v1 = vadd.f32 %v923_v61, %v433_v59  ;;  %v885_v2 = vadd.f32 %v884_v0, %v795_v62 }
 0x16e   : > { %995 = vst [vmem:[#allocation2 + $0x10] sm:$0xff] %v963_v1  ;;  %v948_v3 = vadd.f32 %v885_v2, %v418_v63 }
 0x170   : > { %980 = vst [vmem:[#allocation2 + $0xb8] sm:$0xff] %v948_v3  ;;  %v835_v4 = vpop.f32.mrf.mxu2 }
 0x171   : > { %v924_v6 = vpop.f32.mrf.mxu3 }
 0x172   : > { %v925_v7 = vadd.f32 %v924_v6, %v835_v4  ;;  %v798_v8 = vpop.f32.mrf.mxu0 }
 0x173   : > { %v887_v10 = vpop.f32.mrf.mxu1 }
 0x174   : > { %v964_v11 = vadd.f32 %v925_v7, %v434_v5  ;;  %v888_v12 = vadd.f32 %v887_v10, %v798_v8 }
 0x176   : > { %996 = vst [vmem:[#allocation2 + $0x28] sm:$0xff] %v964_v11  ;;  %v949_v13 = vadd.f32 %v888_v12, %v419_v9 }
 0x178   : > { %981 = vst [vmem:[#allocation2 + $0x60] sm:$0xff] %v949_v13  ;;  %v838_v14 = vpop.f32.mrf.mxu2 }
 0x179   : > { %v927_v16 = vpop.f32.mrf.mxu3 }
 0x17a   : > { %v928_v17 = vadd.f32 %v927_v16, %v838_v14  ;;  %v800_v18 = vpop.f32.mrf.mxu0 }
 0x17b   : > { %v889_v20 = vpop.f32.mrf.mxu1 }
 0x17c   : > { %v965_v21 = vadd.f32 %v928_v17, %v435_v15  ;;  %v890_v22 = vadd.f32 %v889_v20, %v800_v18 }
 0x17e   : > { %997 = vst [vmem:[#allocation2 + $0xa0] sm:$0xff] %v965_v21  ;;  %v950_v23 = vadd.f32 %v890_v22, %v420_v19 }
 0x180   : > { %982 = vst [vmem:[#allocation2 + $0xf0] sm:$0xff] %v950_v23  ;;  %v840_v24 = vpop.f32.mrf.mxu2 }
 0x181   : > { %v929_v26 = vpop.f32.mrf.mxu3 }
 0x182   : > { %v930_v27 = vadd.f32 %v929_v26, %v840_v24  ;;  %v803_v28 = vpop.f32.mrf.mxu0 }
 0x183   : > { %v892_v30 = vpop.f32.mrf.mxu1 }
 0x184   : > { %v966_v31 = vadd.f32 %v930_v27, %v436_v25  ;;  %v893_v32 = vadd.f32 %v892_v30, %v803_v28 }
 0x186   : > { %998 = vst [vmem:[#allocation2 + $0xf8] sm:$0xff] %v966_v31  ;;  %v951_v33 = vadd.f32 %v893_v32, %v421_v29 }
 0x188   : > { %983 = vst [vmem:[#allocation2 + $0x8] sm:$0xff] %v951_v33  ;;  %v843_v34 = vpop.f32.mrf.mxu2 }
 0x189   : > { %v932_v36 = vpop.f32.mrf.mxu3 }
 0x18a   : > { %v933_v37 = vadd.f32 %v932_v36, %v843_v34  ;;  %v805_v38 = vpop.f32.mrf.mxu0 }
 0x18b   : > { %v894_v40 = vpop.f32.mrf.mxu1 }
 0x18c   : > { %v967_v41 = vadd.f32 %v933_v37, %v437_v35  ;;  %v895_v42 = vadd.f32 %v894_v40, %v805_v38 }
 0x18e   : > { %999 = vst [vmem:[#allocation2 + $0x20] sm:$0xff] %v967_v41  ;;  %v952_v43 = vadd.f32 %v895_v42, %v422_v39 }
 0x190   : > { %984 = vst [vmem:[#allocation2 + $0x78] sm:$0xff] %v952_v43  ;;  %v845_v44 = vpop.f32.mrf.mxu2 }
 0x191   : > { %v934_v46 = vpop.f32.mrf.mxu3 }
 0x192   : > { %v935_v47 = vadd.f32 %v934_v46, %v845_v44  ;;  %1004 = sbr.rel (%p1422_p5) target bundleno = 442 (0x1ba), region = 78 }
 0x194   : > { %v968_v48 = vadd.f32 %v935_v47, %v438_v45 }
 0x196   : > { %1000 = vst [vmem:[#allocation2 + $0x98] sm:$0xff] %v968_v48 }
 0x197   : > { %v1005_v49 = vld [vmem:[#allocation2 + $0xb0] sm:$0xff]  ;;  %v1988_v50 = vld [vmem:[%s2107_s2] ss:$0 sm:$0xff]  ;;  %v1007_v52 = vld [vmem:[#allocation2 + $0xd8] sm:$0xff] }
 0x198   : > { %v1006_v51 = vld [vmem:[#allocation2] sm:$0xff]  ;;  %v1008_v53 = vld [vmem:[#allocation2 + $0x18] sm:$0xff]  ;;  %v1041_v54 = vadd.f32 %v1988_v50, %v1005_v49  ;;  %v1043_v56 = vadd.f32 %v1988_v50, %v1007_v52  ;;  %v1009_v57 = vld [vmem:[#allocation2 + $0x50] sm:$0xff] }
 0x199   : > { %v1042_v55 = vadd.f32 %v1988_v50, %v1006_v51  ;;  %v1010_v58 = vld [vmem:[#allocation2 + $0x68] sm:$0xff]  ;;  %v1044_v59 = vadd.f32 %v1988_v50, %v1008_v53  ;;  %v1011_v60 = vld [vmem:[#allocation2 + $0x30] sm:$0xff]  ;;  %v1045_v61 = vadd.f32 %v1988_v50, %v1009_v57  ;;  %v1013_v0 = vld [vmem:[#allocation2 + $0x80] sm:$0xff] }
 0x19a   : > { %1073 = vst [vmem:[%s1901_s28] sm:$0xff] %v1041_v54  ;;  %v1012_v62 = vld [vmem:[#allocation2 + $0x48] sm:$0xff]  ;;  %v1046_v63 = vadd.f32 %v1988_v50, %v1010_v58  ;;  %v1047_v1 = vadd.f32 %v1988_v50, %v1011_v60  ;;  %v1049_v5 = vadd.f32 %v1988_v50, %v1013_v0  ;;  %v1016_v6 = vld [vmem:[#allocation2 + $0xb8] sm:$0xff]  ;;  %v1017_v8 = vld [vmem:[#allocation2 + $0x60] sm:$0xff] }
 0x19b   : > { %1074 = vst [vmem:[%s1901_s28 + $0x8] sm:$0xff] %v1042_v55  ;;  %v1014_v2 = vld [vmem:[#allocation2 + $0x88] sm:$0xff]  ;;  %v1048_v3 = vadd.f32 %v1988_v50, %v1012_v62  ;;  %v1018_v10 = vld [vmem:[#allocation2 + $0xf0] sm:$0xff]  ;;  %v1052_v11 = vadd.f32 %v1988_v50, %v1016_v6  ;;  %v1053_v13 = vadd.f32 %v1988_v50, %v1017_v8  ;;  %v1020_v14 = vld [vmem:[#allocation2 + $0x78] sm:$0xff] }
 0x19c   : > { %1075 = vst [vmem:[%s1901_s28 + $0x10] sm:$0xff] %v1043_v56  ;;  %v1015_v4 = vld [vmem:[#allocation2 + $0xe8] sm:$0xff]  ;;  %v1050_v7 = vadd.f32 %v1988_v50, %v1014_v2  ;;  %v1054_v15 = vadd.f32 %v1988_v50, %v1018_v10  ;;  %v1021_v16 = vld [vmem:[#allocation2 + $0x38] sm:$0xff]  ;;  %v1056_v19 = vadd.f32 %v1988_v50, %v1020_v14  ;;  %v1023_v20 = vld [vmem:[#allocation2 + $0x40] sm:$0xff] }
 0x19d   : > { %1076 = vst [vmem:[%s1901_s28 + $0x18] sm:$0xff] %v1044_v59  ;;  %v1051_v9 = vadd.f32 %v1988_v50, %v1015_v4  ;;  %v1019_v12 = vld [vmem:[#allocation2 + $0x8] sm:$0xff]  ;;  %v1022_v18 = vld [vmem:[#allocation2 + $0x58] sm:$0xff]  ;;  %v1057_v21 = vadd.f32 %v1988_v50, %v1021_v16  ;;  %v1025_v24 = vld [vmem:[#allocation2 + $0xe0] sm:$0xff]  ;;  %v1059_v25 = vadd.f32 %v1988_v50, %v1023_v20 }
 0x19e   : > { %1077 = vst [vmem:[%s1901_s28 + $0x20] sm:$0xff] %v1045_v61  ;;  %v1055_v17 = vadd.f32 %v1988_v50, %v1019_v12  ;;  %v1024_v22 = vld [vmem:[#allocation2 + $0xc8] sm:$0xff]  ;;  %v1058_v23 = vadd.f32 %v1988_v50, %v1022_v18  ;;  %v1026_v26 = vld [vmem:[#allocation2 + $0x90] sm:$0xff]  ;;  %v1061_v29 = vadd.f32 %v1988_v50, %v1025_v24  ;;  %v1028_v30 = vld [vmem:[#allocation2 + $0xc0] sm:$0xff] }
 0x19f   : > { %1078 = vst [vmem:[%s1901_s28 + $0x28] sm:$0xff] %v1046_v63  ;;  %v1060_v27 = vadd.f32 %v1988_v50, %v1024_v22  ;;  %v1027_v28 = vld [vmem:[#allocation2 + $0x70] sm:$0xff]  ;;  %v1062_v31 = vadd.f32 %v1988_v50, %v1026_v26  ;;  %v1029_v32 = vld [vmem:[#allocation2 + $0xa8] sm:$0xff]  ;;  %v1064_v35 = vadd.f32 %v1988_v50, %v1028_v30  ;;  %v1033_v40 = vld [vmem:[#allocation2 + $0xa0] sm:$0xff] }
 0x1a0   : > { %1079 = vst [vmem:[%s1901_s28 + $0x30] sm:$0xff] %v1047_v1  ;;  %v1063_v33 = vadd.f32 %v1988_v50, %v1027_v28  ;;  %v1030_v34 = vld [vmem:[#allocation2 + $0xd0] sm:$0xff]  ;;  %v1065_v37 = vadd.f32 %v1988_v50, %v1029_v32  ;;  %v1032_v38 = vld [vmem:[#allocation2 + $0x28] sm:$0xff]  ;;  %v1034_v42 = vld [vmem:[#allocation2 + $0xf8] sm:$0xff]  ;;  %v1069_v45 = vadd.f32 %v1988_v50, %v1033_v40 }
 0x1a1   : > { %1080 = vst [vmem:[%s1901_s28 + $0x38] sm:$0xff] %v1048_v3  ;;  %v1031_v36 = vld [vmem:[#allocation2 + $0x10] sm:$0xff]  ;;  %v1066_v39 = vadd.f32 %v1988_v50, %v1030_v34  ;;  %v1068_v43 = vadd.f32 %v1988_v50, %v1032_v38  ;;  %v1035_v44 = vld [vmem:[#allocation2 + $0x20] sm:$0xff]  ;;  %v1036_v46 = vld [vmem:[#allocation2 + $0x98] sm:$0xff]  ;;  %v1070_v47 = vadd.f32 %v1988_v50, %v1034_v42 }
 0x1a2   : > { %1081 = vst [vmem:[%s1901_s28 + $0x40] sm:$0xff] %v1049_v5  ;;  %v1067_v41 = vadd.f32 %v1988_v50, %v1031_v36  ;;  %v1071_v48 = vadd.f32 %v1988_v50, %v1035_v44  ;;  %v1072_v49 = vadd.f32 %v1988_v50, %v1036_v46 }
 0x1a3   : > { %1082 = vst [vmem:[%s1901_s28 + $0x48] sm:$0xff] %v1050_v7 }
 0x1a4   : > { %1083 = vst [vmem:[%s1901_s28 + $0x50] sm:$0xff] %v1051_v9 }
 0x1a5   : > { %1084 = vst [vmem:[%s1901_s28 + $0x58] sm:$0xff] %v1052_v11 }
 0x1a6   : > { %1085 = vst [vmem:[%s1901_s28 + $0x60] sm:$0xff] %v1053_v13 }
 0x1a7   : > { %1086 = vst [vmem:[%s1901_s28 + $0x68] sm:$0xff] %v1054_v15 }
 0x1a8   : > { %1087 = vst [vmem:[%s1901_s28 + $0x70] sm:$0xff] %v1055_v17 }
 0x1a9   : > { %1088 = vst [vmem:[%s1901_s28 + $0x78] sm:$0xff] %v1056_v19 }
 0x1aa   : > { %1089 = vst [vmem:[%s1901_s28 + $0x80] sm:$0xff] %v1057_v21 }
 0x1ab   : > { %1090 = vst [vmem:[%s1901_s28 + $0x88] sm:$0xff] %v1058_v23 }
 0x1ac   : > { %1091 = vst [vmem:[%s1901_s28 + $0x90] sm:$0xff] %v1059_v25 }
 0x1ad   : > { %1092 = vst [vmem:[%s1901_s28 + $0x98] sm:$0xff] %v1060_v27 }
 0x1ae   : > { %1093 = vst [vmem:[%s1901_s28 + $0xa0] sm:$0xff] %v1061_v29 }
 0x1af   : > { %1094 = vst [vmem:[%s1901_s28 + $0xa8] sm:$0xff] %v1062_v31 }
 0x1b0   : > { %1095 = vst [vmem:[%s1901_s28 + $0xb0] sm:$0xff] %v1063_v33 }
 0x1b1   : > { %1096 = vst [vmem:[%s1901_s28 + $0xb8] sm:$0xff] %v1064_v35 }
 0x1b2   : > { %1097 = vst [vmem:[%s1901_s28 + $0xc0] sm:$0xff] %v1065_v37 }
 0x1b3   : > { %1098 = vst [vmem:[%s1901_s28 + $0xc8] sm:$0xff] %v1066_v39 }
 0x1b4   : > { %1099 = vst [vmem:[%s1901_s28 + $0xd0] sm:$0xff] %v1067_v41 }
 0x1b5   : > { %1100 = vst [vmem:[%s1901_s28 + $0xd8] sm:$0xff] %v1068_v43 }
 0x1b6   : > { %1101 = vst [vmem:[%s1901_s28 + $0xe0] sm:$0xff] %v1069_v45 }
 0x1b7   : > { %1102 = vst [vmem:[%s1901_s28 + $0xe8] sm:$0xff] %v1070_v47 }
 0x1b8   : > { %1103 = vst [vmem:[%s1901_s28 + $0xf0] sm:$0xff] %v1071_v48 }
 0x1b9   : > { %1104 = vst [vmem:[%s1901_s28 + $0xf8] sm:$0xff] %v1072_v49 }
 0x1ba PF: > { %s1477_s17 = sshll.u32 %s1683_s18, 8  ;;  %s1118_s23 = sshll.u32 %s1901_s28, 4  ;;  %s1119_s23 = int_to_ptr.vmem [resolvable:$true] %s1118_s23 }
 0x1bb   : > { %s1117_s22 = scalar_lea.hbm %s2108_s3, %s1477_s17  ;;  %s1106_s4 = scalar_lea.sflag [#allocation5], %s359_s9 }
 0x1bc   : > { %s1120_s27 = sshll.u32 %s1117_s22, 4  ;;  %s1605_s18 = scalar_lea.hbm %s2108_s3, 512  ;;  %s1121_s27 = int_to_ptr.hbm [resolvable:$true] %s1120_s27 }
 0x1bd   : > { %s1599_s29 = sshra.s32 %s1121_s27, 4  ;;  %s1600_s29 = int_to_ptr.hbm [resolvable:$true] %s1599_s29 }
 0x1be   : > { %s1601_s26 = scalar_lea.hbm %s1600_s29, 256  ;;  %p1606_p10 = scmp.lt.s32.totalorder %s1600_s29, %s2108_s3 }
 0x1bf   : > { %p1602_p6 = scmp.ne.s32.totalorder %s1600_s29, %s1601_s26  ;;  %p1607_p11 = scmp.lt.s32.totalorder %s1605_s18, %s1601_s26 }
 0x1c1   : > { %p1603_p8 = pnand %p1602_p6, %p1792_p7  ;;  %p1608_p13 = por %p1607_p11, %p1606_p10 }
 0x1c3   : > { %p1604_p9 = pneg %p1603_p8 }
 0x1c5   : > { %p1609_p0 = pnand %p1608_p13, %p1604_p9 }
 0x1c7   : > { %1612 = shalt.err (!%p1609_p0)
}
 0x1c8   : > { %s1698_s9 = smov 128   ;;  %s1699_s28 = smov 8  }
 0x1c9   : > { %1494 = dma.vmem_to_hbm [thread:$0]  (%p1792_p7), %s1119_s23, 4096, %s1121_s27, %s1106_s4, %s1698_s9, %s1698_s9, %s1699_s28  }
 0x1ca PF: > { %p1500_p1 = scmp.ge.s32.totalorder %s1695_s21, 2  ;;  %s1135_s17 = sand.u32 1, %s1659_s12  }
 0x1cb   : > { %s1136_s0 = scalar_lea.sflag [#allocation5], %s1135_s17 }
 0x1cc   : > { %p1497_p2 = pnand %p1500_p1, %p1800_p12 }
 0x1ce   : > { %p1498_p3 = pneg %p1497_p2 }
 0x1d0   : > { %1654 = dma.done.wait (%p1498_p3), %s1136_s0, 4096  }
 0x1d1   : > { %1656 = vsyncadd (%p1498_p3), %s1136_s0, 4294963200  ;;  %s16_s21 = sadd.s32 1, %s1695_s21   ;;  %s2114_s12 = smov %s1663_s13 }
 0x1d2   : > { %p13_p4 = scmp.ge.s32.totalorder %s16_s21, 6   ;;  %s2115_s13 = smov %s1667_s14 }
 0x1d3   : > { %s2116_s14 = smov %s1805_s7  ;;  %s2117_s15 = smov %s1675_s16 }
 0x1d4   : > { %s2118_s16 = smov %s1808_s8  ;;  %s2119_s17 = smov %s1687_s19 }
 0x1d5   : > { %s2120_s18 = smov %s1691_s20  ;;  %s2121_s19 = smov %s2124_s24 }
 0x1d6   : > { %s2122_s20 = smov %s2128_s25  ;;  %15 = sbr.rel (!%p13_p4) target bundleno = 8 (0x8), region = 121 }
 0x1db   :  { %1142 = vsyncpa [#allocation5], 1 }
 0x1dc   :  { %1144 = vsyncpa [#allocation5 + $0x1], 1 }

</bundles_post_ra>
